<compile_context>
chip_gen: v5e
topology: v5e:2x2
jax: 0.10.0
libtpu: 0.0.40
codegen_flags: <defaults>
</compile_context>

<pallas_src>
import math
from functools import partial

import jax
import jax.numpy as jnp
from jax import lax
from jax.experimental import pallas as pl
from jax.experimental.pallas import tpu as pltpu

NEG_INF = -1e30


# ----------------------------- in-kernel helpers -----------------------------

def _mm(a, b):
    # f32 x f32 = f32 everywhere (bf16 dots are not supported by the interpret backend).
    return jnp.dot(a, b, preferred_element_type=jnp.float32)


def _leaky(v, slope=0.01):
    return jnp.where(v > 0, v, slope * v)


def _elu(v):
    return jnp.where(v > 0, v, jnp.exp(jnp.minimum(v, 0.0)) - 1.0)


def _src_mat(src_col, n_nodes):
    # src_col: [E,1] int32 -> one-hot gather matrix [E,N] (node features -> edges)
    e = src_col.shape[0]
    col = lax.broadcasted_iota(jnp.int32, (e, n_nodes), 1)
    return (src_col == col).astype(jnp.float32)


def _dst_mats(dst_col, dst_row, n_groups):
    # dst_col: [E,1], dst_row: [1,E] int32
    # returns sdst [E,G] (gather group -> edge) and sdstT [G,E] (scatter-add edge -> group)
    e = dst_col.shape[0]
    col = lax.broadcasted_iota(jnp.int32, (e, n_groups), 1)
    sdst = (dst_col == col).astype(jnp.float32)
    row = lax.broadcasted_iota(jnp.int32, (n_groups, e), 0)
    sdstT = (dst_row == row).astype(jnp.float32)
    return sdst, sdstT


def _segment_softmax(alpha, sdst, sdstT):
    # alpha : [E,1] per-edge score, sdst: [E,G] one-hot of destination group, sdstT: [G,E]
    masked = jnp.where(sdst > 0.5, alpha, NEG_INF)            # [E,G]  (VPU select)
    gmax = jnp.max(masked, axis=0, keepdims=True)             # [1,G]  (XLU reduce)
    gmax_e = _mm(sdst, jnp.transpose(gmax))                   # [E,1]  gather via MXU
    a_exp = jnp.exp(alpha - gmax_e)                           # [E,1]  (EUP)
    denom = _mm(sdstT, a_exp)                                 # [G,1]  (MXU segment-sum)
    denom_e = _mm(sdst, denom)                                # [E,1]  gather via MXU
    return a_exp / (denom_e + 1e-16)


def _gru_relu(inp, hid, wi, wh, bi, bh):
    # torch.nn.GRUCell (gate order r, z, n) fused with the .relu_() that follows it.
    # wi/wh packed [H,3H], bi/bh packed [1,3H].
    H = hid.shape[1]
    gi = _mm(inp, wi) + bi                                    # [*,3H]
    gh = _mm(hid, wh) + bh                                    # [*,3H]
    r = jax.nn.sigmoid(gi[:, :H] + gh[:, :H])
    z = jax.nn.sigmoid(gi[:, H:2 * H] + gh[:, H:2 * H])
    n = jnp.tanh(gi[:, 2 * H:] + r * gh[:, 2 * H:])
    return jnp.maximum((1.0 - z) * n + z * hid, 0.0)


# --------------------------------- kernels -----------------------------------

def gate_layer_kernel(x_ref, ea_ref, src_ref, dst_ref, dstT_ref,
                      l1w_ref, l1b_ref,
                      gwx_ref, gwe_ref, attl_ref, attr_ref, gl2w_ref, gb_ref,
                      wi_ref, wh_ref, bi_ref, bh_ref, o_ref):
    # x = leaky_relu(lin1(x_raw))
    x = _leaky(_mm(x_ref[...], l1w_ref[...]) + l1b_ref[...])            # [N,H]
    n_nodes = x.shape[0]

    ssrc = _src_mat(src_ref[...], n_nodes)                              # [E,N]
    sdst, sdstT = _dst_mats(dst_ref[...], dstT_ref[...], n_nodes)       # [E,N],[N,E]

    # GATEConv (aggr='add') fused with the ELU that follows it.
    x_j = _mm(ssrc, x)                                                  # [E,H] gather src
    # split-weight form of lin1(cat([x_j, edge_attr]))
    h_j = _leaky(_mm(x_j, gwx_ref[...]) + _mm(ea_ref[...], gwe_ref[...]))
    xr = _mm(x, attr_ref[...])                                          # [N,1] node-level att_r
    alpha = _leaky(_mm(h_j, attl_ref[...]) + _mm(sdst, xr))             # [E,1]
    a_norm = _segment_softmax(alpha, sdst, sdstT)
    msg = _mm(h_j, gl2w_ref[...]) * a_norm                              # [E,H]
    h = _elu(_mm(sdstT, msg) + gb_ref[...])                             # [N,H] scatter-add + bias

    # x = gru(h, x).relu_()
    o_ref[...] = _gru_relu(h, x, wi_ref[...], wh_ref[...], bi_ref[...], bh_ref[...])


def atom_layers_kernel(x_ref, src_ref, dst_ref, dstT_ref,
                       lw_ref, att_ref, b_ref,
                       wi_ref, wh_ref, bi_ref, bh_ref, x_out_ref):
    # One grid step == one atom layer: GATConv(xs==xd) + ELU + GRU + relu.
    # x_out_ref is the VMEM-resident node state across all layers (constant out index).
    @pl.when(pl.program_id(0) == 0)
    def _():
        x_out_ref[...] = x_ref[...]

    x = x_out_ref[...]                                                  # [N,H]
    n_nodes = x.shape[0]

    ssrc = _src_mat(src_ref[...], n_nodes)
    sdst, sdstT = _dst_mats(dst_ref[...], dstT_ref[...], n_nodes)

    lw = lw_ref[0]                                                      # [H,H]  (this layer)
    att = att_ref[0]                                                    # [H,2]  (src|dst packed)
    b = b_ref[0]                                                        # [1,H]

    xt = _mm(x, lw)                                                     # [N,H] computed ONCE
    a_nd = _mm(xt, att)                                                 # [N,2]
    alpha = _leaky(_mm(ssrc, a_nd[:, 0:1]) + _mm(sdst, a_nd[:, 1:2]))   # [E,1]
    a_norm = _segment_softmax(alpha, sdst, sdstT)
    msg = _mm(ssrc, xt) * a_norm                                        # [E,H]
    h = _elu(_mm(sdstT, msg) + b)                                       # [N,H]

    x_out_ref[...] = _gru_relu(h, x, wi_ref[0], wh_ref[0], bi_ref[0], bh_ref[0])


def make_mol_kernel(num_timesteps):
    def kernel(x_ref, bcol_ref, brow_ref,
               lw_ref, asrc_ref, adst_ref, b_ref,
               wi_ref, wh_ref, bi_ref, bh_ref,
               l2w_ref, l2b_ref, o_ref):
        # pool + relu, then num_timesteps of (mol GATConv + ELU + mol GRU + relu), then lin2.
        x = x_ref[...]                                                  # [N,H]
        n_mols = o_ref.shape[0]
        mdst, mdstT = _dst_mats(bcol_ref[...], brow_ref[...], n_mols)   # [N,B],[B,N]

        lw, asrc, adst, b = lw_ref[...], asrc_ref[...], adst_ref[...], b_ref[...]
        wi, wh, bi, bh = wi_ref[...], wh_ref[...], bi_ref[...], bh_ref[...]

        out = jnp.maximum(_mm(mdstT, x), 0.0)                           # global_add_pool + relu

        # molecule-conv source side is the identity gather (src = arange(N)) -> loop-invariant
        xs_t = _mm(x, lw)                                               # [N,H]
        a_src = _mm(xs_t, asrc)                                         # [N,1]

        for _ in range(num_timesteps):                                  # static unroll
            xd_t = _mm(out, lw)                                         # [B,H]
            a_dst = _mm(xd_t, adst)                                     # [B,1]
            alpha = _leaky(a_src + _mm(mdst, a_dst))                    # [N,1]
            a_norm = _segment_softmax(alpha, mdst, mdstT)               # [N,1]
            msg = xs_t * a_norm                                         # [N,H]
            h = _elu(_mm(mdstT, msg) + b)                               # [B,H]
            out = _gru_relu(h, out, wi, wh, bi, bh)

        o_ref[...] = _mm(out, l2w_ref[...]) + l2b_ref[...]              # lin2 (no activation)
    return kernel


# ------------------------------- pallas glue ----------------------------------

_VMEM = pl.BlockSpec(memory_space=pltpu.MemorySpace.VMEM)


def _single_block_call(kernel, out_shape, *args):
    return pl.pallas_call(
        kernel,
        out_shape=jax.ShapeDtypeStruct(out_shape, jnp.float32),
        in_specs=[_VMEM] * len(args),
        out_specs=_VMEM,
    )(*args)


@partial(jax.jit, static_argnames=("num_mols", "num_layers", "num_timesteps"))
def attentive_fp_forward(pp, x, edge_index, edge_attr, batch, *,
                         num_mols, num_layers, num_timesteps):
    n_nodes = x.shape[0]
    n_edges = edge_attr.shape[0]
    hid = pp["lin1_w"].shape[1]
    out_c = pp["lin2_w"].shape[1]

    src = edge_index[0].astype(jnp.int32)
    dst = edge_index[1].astype(jnp.int32)
    src_col = src[:, None]                      # [E,1]
    dst_col = dst[:, None]                      # [E,1]
    dst_row = dst[None, :]                      # [1,E]
    batch_i = batch.astype(jnp.int32)
    batch_col = batch_i[:, None]                # [N,1]
    batch_row = batch_i[None, :]                # [1,N]

    # (1) lin1 + leaky + GATEConv + ELU + GRU + relu
    g, gr = pp["gate"], pp["gru1"]
    x = _single_block_call(
        gate_layer_kernel, (n_nodes, hid),
        x, edge_attr, src_col, dst_col, dst_row,
        pp["lin1_w"], pp["lin1_b"],
        g["w_x"], g["w_e"], g["att_l"], g["att_r"], g["lin2_w"], g["bias"],
        gr["wi"], gr["wh"], gr["bi"], gr["bh"])

    # (2) ALL atom layers in ONE pallas_call: grid over layers, stacked per-layer weights,
    #     x resident in VMEM, edge indices resident via constant index_maps.
    if num_layers > 1:
        a = pp["atom"]
        L = num_layers - 1
        const = lambda shape: pl.BlockSpec(shape, lambda l: (0,) * len(shape))
        per_layer = lambda shape: pl.BlockSpec((1,) + shape, lambda l: (l,) + (0,) * len(shape))
        x = pl.pallas_call(
            atom_layers_kernel,
            out_shape=jax.ShapeDtypeStruct((n_nodes, hid), jnp.float32),
            grid=(L,),
            in_specs=[
                const((n_nodes, hid)),           # x seed
                const((n_edges, 1)),             # src indices
                const((n_edges, 1)),             # dst indices
                const((1, n_edges)),             # dst indices (row layout)
                per_layer((hid, hid)),           # lin_w
                per_layer((hid, 2)),             # packed [att_src | att_dst]
                per_layer((1, hid)),             # bias
                per_layer((hid, 3 * hid)),       # gru wi
                per_layer((hid, 3 * hid)),       # gru wh
                per_layer((1, 3 * hid)),         # gru bi
                per_layer((1, 3 * hid)),         # gru bh
            ],
            out_specs=const((n_nodes, hid)),
            compiler_params=pltpu.CompilerParams(dimension_semantics=("arbitrary",)),
        )(x, src_col, dst_col, dst_row,
          a["lw"], a["att"], a["bias"], a["wi"], a["wh"], a["bi"], a["bh"])

    # (3) pool + relu + all timesteps of mol conv/GRU + lin2, fused in one kernel
    mc, gr = pp["mol_conv"], pp["mol_gru"]
    return _single_block_call(
        make_mol_kernel(num_timesteps), (num_mols, out_c),
        x, batch_col, batch_row,
        mc["lin_w"], mc["att_src"], mc["att_dst"], mc["bias"],
        gr["wi"], gr["wh"], gr["bi"], gr["bh"],
        pp["lin2_w"], pp["lin2_b"])


# ------------------------------- parameters -----------------------------------

def init_params(key, in_c, hid, out_c, edge_d, num_layers):
    keys = iter(jax.random.split(key, 64))

    def glorot(shape):
        fan_in, fan_out = shape[0], shape[-1]
        lim = math.sqrt(6.0 / (fan_in + fan_out))
        return jax.random.uniform(next(keys), shape, jnp.float32, -lim, lim)

    def gru():
        p = {}
        for g in ("r", "z", "n"):
            p[f"wi{g}"] = glorot((hid, hid))
            p[f"wh{g}"] = glorot((hid, hid))
            p[f"bi{g}"] = glorot((1, hid))
            p[f"bh{g}"] = glorot((1, hid))
        return p

    def gat():
        return {"lin_w": glorot((hid, hid)),
                "att_src": glorot((hid, 1)),
                "att_dst": glorot((hid, 1)),
                "bias": jnp.zeros((1, hid), jnp.float32)}

    return {
        "lin1_w": glorot((in_c, hid)),
        "lin1_b": glorot((1, hid)),
        "gate_conv": {"lin1_w": glorot((hid + edge_d, hid)),
                      "lin2_w": glorot((hid, hid)),
                      "att_l": glorot((hid, 1)),
                      "att_r": glorot((hid, 1)),
                      "bias": jnp.zeros((1, hid), jnp.float32)},
        "gru1": gru(),
        "atom_convs": [gat() for _ in range(num_layers - 1)],
        "atom_grus": [gru() for _ in range(num_layers - 1)],
        "mol_conv": gat(),
        "mol_gru": gru(),
        "lin2_w": glorot((hid, out_c)),
        "lin2_b": jnp.zeros((1, out_c), jnp.float32),
    }


def prepare_params(p, num_layers):
    """Pack GRU weights to [H,3H] (2 matmuls instead of 6), split GATEConv lin1 into node/edge
    blocks, pack atom-conv attention columns into [H,2], and stack per-atom-layer weights along
    a leading layer axis for the fused grid kernel. Everything stays f32."""
    hid = p["lin1_w"].shape[1]

    def pack_gru(g):
        return {"wi": jnp.concatenate([g["wir"], g["wiz"], g["win"]], axis=1),
                "wh": jnp.concatenate([g["whr"], g["whz"], g["whn"]], axis=1),
                "bi": jnp.concatenate([g["bir"], g["biz"], g["bin"]], axis=1),
                "bh": jnp.concatenate([g["bhr"], g["bhz"], g["bhn"]], axis=1)}

    g = p["gate_conv"]
    pp = {
        "lin1_w": p["lin1_w"], "lin1_b": p["lin1_b"],
        "gate": {"w_x": g["lin1_w"][:hid],      # node-feature block of lin1
                 "w_e": g["lin1_w"][hid:],      # edge-attr block of lin1
                 "att_l": g["att_l"], "att_r": g["att_r"],
                 "lin2_w": g["lin2_w"], "bias": g["bias"]},
        "gru1": pack_gru(p["gru1"]),
        "mol_conv": p["mol_conv"],
        "mol_gru": pack_gru(p["mol_gru"]),
        "lin2_w": p["lin2_w"], "lin2_b": p["lin2_b"],
    }
    if num_layers > 1:
        convs = p["atom_convs"]
        grus = [pack_gru(g) for g in p["atom_grus"]]
        st = lambda xs: jnp.stack(xs, axis=0)
        pp["atom"] = {
            "lw": st([c["lin_w"] for c in convs]),                                         # [L,H,H]
            "att": st([jnp.concatenate([c["att_src"], c["att_dst"]], axis=1) for c in convs]),  # [L,H,2]
            "bias": st([c["bias"] for c in convs]),                                        # [L,1,H]
            "wi": st([g["wi"] for g in grus]), "wh": st([g["wh"] for g in grus]),          # [L,H,3H]
            "bi": st([g["bi"] for g in grus]), "bh": st([g["bh"] for g in grus]),          # [L,1,3H]
        }
    return pp


# ---------------------------------- main ---------------------------------------

if __name__ == "__main__":
    IN_C, HID, OUT_C, EDGE_D = 16, 32, 4, 8
    NUM_LAYERS, NUM_TIMESTEPS = 2, 2
    N_NODES, N_MOLS, N_EDGES = 8, 2, 16

    key = jax.random.PRNGKey(0)
    k_x, k_e, k_p = jax.random.split(key, 3)

    x = jax.random.normal(k_x, (N_NODES, IN_C), jnp.float32)
    edge_attr = jax.random.normal(k_e, (N_EDGES, EDGE_D), jnp.float32)
    # two 4-node ring molecules, edges in both directions -> 16 edges
    src = jnp.array([0, 1, 2, 3, 1, 2, 3, 0, 4, 5, 6, 7, 5, 6, 7, 4], jnp.int32)
    dst = jnp.array([1, 2, 3, 0, 0, 1, 2, 3, 5, 6, 7, 4, 4, 5, 6, 7], jnp.int32)
    edge_index = jnp.stack([src, dst])
    batch = jnp.array([0, 0, 0, 0, 1, 1, 1, 1], jnp.int32)

    params = init_params(k_p, IN_C, HID, OUT_C, EDGE_D, NUM_LAYERS)
    pp = prepare_params(params, NUM_LAYERS)

    out = attentive_fp_forward(pp, x, edge_index, edge_attr, batch,
                               num_mols=N_MOLS, num_layers=NUM_LAYERS,
                               num_timesteps=NUM_TIMESTEPS)
    jax.block_until_ready(out)
    assert out.shape == (N_MOLS, OUT_C) and out.dtype == jnp.float32
    assert bool(jnp.all(jnp.isfinite(out)))
    print("KERNEL_OK")
</pallas_src>

<mosaic_0001>
module attributes {stable_mosaic.version = 11 : i64} {
  func.func @kernel(%arg0: memref<8x32xf32, #tpu.memory_space<vmem>>, %arg1: memref<8x1xi32, #tpu.memory_space<vmem>>, %arg2: memref<1x8xi32, #tpu.memory_space<vmem>>, %arg3: memref<32x32xf32, #tpu.memory_space<vmem>>, %arg4: memref<32x1xf32, #tpu.memory_space<vmem>>, %arg5: memref<32x1xf32, #tpu.memory_space<vmem>>, %arg6: memref<1x32xf32, #tpu.memory_space<vmem>>, %arg7: memref<32x96xf32, #tpu.memory_space<vmem>>, %arg8: memref<32x96xf32, #tpu.memory_space<vmem>>, %arg9: memref<1x96xf32, #tpu.memory_space<vmem>>, %arg10: memref<1x96xf32, #tpu.memory_space<vmem>>, %arg11: memref<32x4xf32, #tpu.memory_space<vmem>>, %arg12: memref<1x4xf32, #tpu.memory_space<vmem>>, %arg13: memref<2x4xf32, #tpu.memory_space<vmem>>) attributes {dimension_semantics = [], scalar_prefetch = 0 : i64, scratch_operands = 0 : i64, tpu.core_type = #tpu.core_type<tc>} {
    %c0 = arith.constant 0 : index
    %c0_0 = arith.constant 0 : index
    %0 = vector.load %arg0[%c0, %c0_0] : memref<8x32xf32, #tpu.memory_space<vmem>>, vector<8x32xf32>
    %c0_1 = arith.constant 0 : index
    %c0_2 = arith.constant 0 : index
    %1 = vector.load %arg1[%c0_1, %c0_2] : memref<8x1xi32, #tpu.memory_space<vmem>>, vector<8x1xi32>
    %c0_3 = arith.constant 0 : index
    %c0_4 = arith.constant 0 : index
    %2 = vector.load %arg2[%c0_3, %c0_4] : memref<1x8xi32, #tpu.memory_space<vmem>>, vector<1x8xi32>
    %3 = tpu.iota {dimensions = array<i32: 1>} : vector<8x2xi32>
    %4 = vector.broadcast %1 : vector<8x1xi32> to vector<8x2xi32>
    %5 = arith.cmpi eq, %4, %3 : vector<8x2xi32>
    %6 = arith.extui %5 : vector<8x2xi1> to vector<8x2xi32>
    %7 = arith.sitofp %6 : vector<8x2xi32> to vector<8x2xf32>
    %8 = tpu.iota {dimensions = array<i32: 0>} : vector<2x8xi32>
    %9 = vector.broadcast %2 : vector<1x8xi32> to vector<2x8xi32>
    %10 = arith.cmpi eq, %9, %8 : vector<2x8xi32>
    %11 = arith.extui %10 : vector<2x8xi1> to vector<2x8xi32>
    %12 = arith.sitofp %11 : vector<2x8xi32> to vector<2x8xf32>
    %c0_5 = arith.constant 0 : index
    %c0_6 = arith.constant 0 : index
    %13 = vector.load %arg3[%c0_5, %c0_6] : memref<32x32xf32, #tpu.memory_space<vmem>>, vector<32x32xf32>
    %c0_7 = arith.constant 0 : index
    %c0_8 = arith.constant 0 : index
    %14 = vector.load %arg4[%c0_7, %c0_8] : memref<32x1xf32, #tpu.memory_space<vmem>>, vector<32x1xf32>
    %c0_9 = arith.constant 0 : index
    %c0_10 = arith.constant 0 : index
    %15 = vector.load %arg5[%c0_9, %c0_10] : memref<32x1xf32, #tpu.memory_space<vmem>>, vector<32x1xf32>
    %c0_11 = arith.constant 0 : index
    %c0_12 = arith.constant 0 : index
    %16 = vector.load %arg6[%c0_11, %c0_12] : memref<1x32xf32, #tpu.memory_space<vmem>>, vector<1x32xf32>
    %c0_13 = arith.constant 0 : index
    %c0_14 = arith.constant 0 : index
    %17 = vector.load %arg7[%c0_13, %c0_14] : memref<32x96xf32, #tpu.memory_space<vmem>>, vector<32x96xf32>
    %c0_15 = arith.constant 0 : index
    %c0_16 = arith.constant 0 : index
    %18 = vector.load %arg8[%c0_15, %c0_16] : memref<32x96xf32, #tpu.memory_space<vmem>>, vector<32x96xf32>
    %c0_17 = arith.constant 0 : index
    %c0_18 = arith.constant 0 : index
    %19 = vector.load %arg9[%c0_17, %c0_18] : memref<1x96xf32, #tpu.memory_space<vmem>>, vector<1x96xf32>
    %c0_19 = arith.constant 0 : index
    %c0_20 = arith.constant 0 : index
    %20 = vector.load %arg10[%c0_19, %c0_20] : memref<1x96xf32, #tpu.memory_space<vmem>>, vector<1x96xf32>
    %cst = arith.constant dense<0.000000e+00> : vector<2x32xf32>
    %21 = tpu.matmul %12, %0, %cst {dimension_numbers = #tpu.dot_dimension_numbers<[1], [0], [0], [1], [0, 0, 1, 1], [], []>} : vector<2x8xf32>, vector<8x32xf32>, vector<2x32xf32> -> vector<2x32xf32>
    %cst_21 = arith.constant 0.000000e+00 : f32
    %22 = vector.broadcast %cst_21 : f32 to vector<2x32xf32>
    %23 = arith.maximumf %21, %22 : vector<2x32xf32>
    %cst_22 = arith.constant dense<0.000000e+00> : vector<8x32xf32>
    %24 = tpu.matmul %0, %13, %cst_22 {dimension_numbers = #tpu.dot_dimension_numbers<[1], [0], [0], [1], [0, 0, 1, 1], [], []>} : vector<8x32xf32>, vector<32x32xf32>, vector<8x32xf32> -> vector<8x32xf32>
    %cst_23 = arith.constant dense<0.000000e+00> : vector<8x1xf32>
    %25 = tpu.matmul %24, %14, %cst_23 {dimension_numbers = #tpu.dot_dimension_numbers<[1], [0], [0], [1], [0, 0, 1, 1], [], []>} : vector<8x32xf32>, vector<32x1xf32>, vector<8x1xf32> -> vector<8x1xf32>
    %cst_24 = arith.constant dense<0.000000e+00> : vector<2x32xf32>
    %26 = tpu.matmul %23, %13, %cst_24 {dimension_numbers = #tpu.dot_dimension_numbers<[1], [0], [0], [1], [0, 0, 1, 1], [], []>} : vector<2x32xf32>, vector<32x32xf32>, vector<2x32xf32> -> vector<2x32xf32>
    %cst_25 = arith.constant dense<0.000000e+00> : vector<2x1xf32>
    %27 = tpu.matmul %26, %15, %cst_25 {dimension_numbers = #tpu.dot_dimension_numbers<[1], [0], [0], [1], [0, 0, 1, 1], [], []>} : vector<2x32xf32>, vector<32x1xf32>, vector<2x1xf32> -> vector<2x1xf32>
    %cst_26 = arith.constant dense<0.000000e+00> : vector<8x1xf32>
    %28 = tpu.matmul %7, %27, %cst_26 {dimension_numbers = #tpu.dot_dimension_numbers<[1], [0], [0], [1], [0, 0, 1, 1], [], []>} : vector<8x2xf32>, vector<2x1xf32>, vector<8x1xf32> -> vector<8x1xf32>
    %29 = arith.addf %25, %28 : vector<8x1xf32>
    %cst_27 = arith.constant 0.000000e+00 : f32
    %30 = vector.broadcast %cst_27 : f32 to vector<8x1xf32>
    %31 = arith.cmpf ogt, %29, %30 : vector<8x1xf32>
    %cst_28 = arith.constant 0.00999999977 : f32
    %32 = vector.broadcast %cst_28 : f32 to vector<8x1xf32>
    %33 = arith.mulf %32, %29 : vector<8x1xf32>
    %34 = arith.select %31, %29, %33 : vector<8x1xi1>, vector<8x1xf32>
    %cst_29 = arith.constant 5.000000e-01 : f32
    %35 = vector.broadcast %cst_29 : f32 to vector<8x2xf32>
    %36 = arith.cmpf ogt, %7, %35 : vector<8x2xf32>
    %cst_30 = arith.constant -1.000000e+30 : f32
    %37 = vector.shape_cast %34 : vector<8x1xf32> to vector<8x1xf32>
    %38 = vector.broadcast %37 : vector<8x1xf32> to vector<8x2xf32>
    %39 = vector.broadcast %cst_30 : f32 to vector<8x2xf32>
    %40 = arith.select %36, %38, %39 : vector<8x2xi1>, vector<8x2xf32>
    %cst_31 = arith.constant dense<0xFF800000> : vector<2xf32>
    %41 = vector.multi_reduction <maximumf>, %40, %cst_31 [0] : vector<8x2xf32> to vector<2xf32>
    %42 = vector.shape_cast %41 : vector<2xf32> to vector<1x2xf32>
    %43 = tpu.transpose %42, [1, 0] : vector<1x2xf32> -> vector<2x1xf32>
    %cst_32 = arith.constant dense<0.000000e+00> : vector<8x1xf32>
    %44 = tpu.matmul %7, %43, %cst_32 {dimension_numbers = #tpu.dot_dimension_numbers<[1], [0], [0], [1], [0, 0, 1, 1], [], []>} : vector<8x2xf32>, vector<2x1xf32>, vector<8x1xf32> -> vector<8x1xf32>
    %45 = arith.subf %34, %44 : vector<8x1xf32>
    %46 = math.exp %45 : vector<8x1xf32>
    %cst_33 = arith.constant dense<0.000000e+00> : vector<2x1xf32>
    %47 = tpu.matmul %12, %46, %cst_33 {dimension_numbers = #tpu.dot_dimension_numbers<[1], [0], [0], [1], [0, 0, 1, 1], [], []>} : vector<2x8xf32>, vector<8x1xf32>, vector<2x1xf32> -> vector<2x1xf32>
    %cst_34 = arith.constant dense<0.000000e+00> : vector<8x1xf32>
    %48 = tpu.matmul %7, %47, %cst_34 {dimension_numbers = #tpu.dot_dimension_numbers<[1], [0], [0], [1], [0, 0, 1, 1], [], []>} : vector<8x2xf32>, vector<2x1xf32>, vector<8x1xf32> -> vector<8x1xf32>
    %cst_35 = arith.constant 1.000000e-16 : f32
    %49 = vector.broadcast %cst_35 : f32 to vector<8x1xf32>
    %50 = arith.addf %48, %49 : vector<8x1xf32>
    %51 = arith.divf %46, %50 : vector<8x1xf32>
    %52 = vector.broadcast %51 : vector<8x1xf32> to vector<8x32xf32>
    %53 = arith.mulf %24, %52 : vector<8x32xf32>
    %cst_36 = arith.constant dense<0.000000e+00> : vector<2x32xf32>
    %54 = tpu.matmul %12, %53, %cst_36 {dimension_numbers = #tpu.dot_dimension_numbers<[1], [0], [0], [1], [0, 0, 1, 1], [], []>} : vector<2x8xf32>, vector<8x32xf32>, vector<2x32xf32> -> vector<2x32xf32>
    %55 = vector.broadcast %16 : vector<1x32xf32> to vector<2x32xf32>
    %56 = arith.addf %54, %55 : vector<2x32xf32>
    %cst_37 = arith.constant 0.000000e+00 : f32
    %57 = vector.broadcast %cst_37 : f32 to vector<2x32xf32>
    %58 = arith.cmpf ogt, %56, %57 : vector<2x32xf32>
    %cst_38 = arith.constant 0.000000e+00 : f32
    %59 = vector.broadcast %cst_38 : f32 to vector<2x32xf32>
    %60 = arith.minimumf %56, %59 : vector<2x32xf32>
    %61 = math.exp %60 : vector<2x32xf32>
    %cst_39 = arith.constant 1.000000e+00 : f32
    %62 = vector.broadcast %cst_39 : f32 to vector<2x32xf32>
    %63 = arith.subf %61, %62 : vector<2x32xf32>
    %64 = arith.select %58, %56, %63 : vector<2x32xi1>, vector<2x32xf32>
    %cst_40 = arith.constant dense<0.000000e+00> : vector<2x96xf32>
    %65 = tpu.matmul %64, %17, %cst_40 {dimension_numbers = #tpu.dot_dimension_numbers<[1], [0], [0], [1], [0, 0, 1, 1], [], []>} : vector<2x32xf32>, vector<32x96xf32>, vector<2x96xf32> -> vector<2x96xf32>
    %66 = vector.broadcast %19 : vector<1x96xf32> to vector<2x96xf32>
    %67 = arith.addf %65, %66 : vector<2x96xf32>
    %cst_41 = arith.constant dense<0.000000e+00> : vector<2x96xf32>
    %68 = tpu.matmul %23, %18, %cst_41 {dimension_numbers = #tpu.dot_dimension_numbers<[1], [0], [0], [1], [0, 0, 1, 1], [], []>} : vector<2x32xf32>, vector<32x96xf32>, vector<2x96xf32> -> vector<2x96xf32>
    %69 = vector.broadcast %20 : vector<1x96xf32> to vector<2x96xf32>
    %70 = arith.addf %68, %69 : vector<2x96xf32>
    %71 = vector.extract_strided_slice %67 {offsets = [0, 0], sizes = [2, 32], strides = [1, 1]} : vector<2x96xf32> to vector<2x32xf32>
    %72 = vector.extract_strided_slice %70 {offsets = [0, 0], sizes = [2, 32], strides = [1, 1]} : vector<2x96xf32> to vector<2x32xf32>
    %73 = arith.addf %71, %72 : vector<2x32xf32>
    %74 = arith.negf %73 : vector<2x32xf32>
    %75 = math.exp %74 : vector<2x32xf32>
    %cst_42 = arith.constant 1.000000e+00 : f32
    %76 = vector.broadcast %cst_42 : f32 to vector<2x32xf32>
    %77 = arith.addf %76, %75 : vector<2x32xf32>
    %78 = arith.divf %76, %77 : vector<2x32xf32>
    %79 = vector.extract_strided_slice %67 {offsets = [0, 32], sizes = [2, 32], strides = [1, 1]} : vector<2x96xf32> to vector<2x32xf32>
    %80 = vector.extract_strided_slice %70 {offsets = [0, 32], sizes = [2, 32], strides = [1, 1]} : vector<2x96xf32> to vector<2x32xf32>
    %81 = arith.addf %79, %80 : vector<2x32xf32>
    %82 = arith.negf %81 : vector<2x32xf32>
    %83 = math.exp %82 : vector<2x32xf32>
    %cst_43 = arith.constant 1.000000e+00 : f32
    %84 = vector.broadcast %cst_43 : f32 to vector<2x32xf32>
    %85 = arith.addf %84, %83 : vector<2x32xf32>
    %86 = arith.divf %84, %85 : vector<2x32xf32>
    %87 = vector.extract_strided_slice %67 {offsets = [0, 64], sizes = [2, 32], strides = [1, 1]} : vector<2x96xf32> to vector<2x32xf32>
    %88 = vector.extract_strided_slice %70 {offsets = [0, 64], sizes = [2, 32], strides = [1, 1]} : vector<2x96xf32> to vector<2x32xf32>
    %89 = arith.mulf %78, %88 : vector<2x32xf32>
    %90 = arith.addf %87, %89 : vector<2x32xf32>
    %91 = math.tanh %90 : vector<2x32xf32>
    %cst_44 = arith.constant 1.000000e+00 : f32
    %92 = vector.broadcast %cst_44 : f32 to vector<2x32xf32>
    %93 = arith.subf %92, %86 : vector<2x32xf32>
    %94 = arith.mulf %93, %91 : vector<2x32xf32>
    %95 = arith.mulf %86, %23 : vector<2x32xf32>
    %96 = arith.addf %94, %95 : vector<2x32xf32>
    %cst_45 = arith.constant 0.000000e+00 : f32
    %97 = vector.broadcast %cst_45 : f32 to vector<2x32xf32>
    %98 = arith.maximumf %96, %97 : vector<2x32xf32>
    %cst_46 = arith.constant dense<0.000000e+00> : vector<2x32xf32>
    %99 = tpu.matmul %98, %13, %cst_46 {dimension_numbers = #tpu.dot_dimension_numbers<[1], [0], [0], [1], [0, 0, 1, 1], [], []>} : vector<2x32xf32>, vector<32x32xf32>, vector<2x32xf32> -> vector<2x32xf32>
    %cst_47 = arith.constant dense<0.000000e+00> : vector<2x1xf32>
    %100 = tpu.matmul %99, %15, %cst_47 {dimension_numbers = #tpu.dot_dimension_numbers<[1], [0], [0], [1], [0, 0, 1, 1], [], []>} : vector<2x32xf32>, vector<32x1xf32>, vector<2x1xf32> -> vector<2x1xf32>
    %cst_48 = arith.constant dense<0.000000e+00> : vector<8x1xf32>
    %101 = tpu.matmul %7, %100, %cst_48 {dimension_numbers = #tpu.dot_dimension_numbers<[1], [0], [0], [1], [0, 0, 1, 1], [], []>} : vector<8x2xf32>, vector<2x1xf32>, vector<8x1xf32> -> vector<8x1xf32>
    %102 = arith.addf %25, %101 : vector<8x1xf32>
    %cst_49 = arith.constant 0.000000e+00 : f32
    %103 = vector.broadcast %cst_49 : f32 to vector<8x1xf32>
    %104 = arith.cmpf ogt, %102, %103 : vector<8x1xf32>
    %cst_50 = arith.constant 0.00999999977 : f32
    %105 = vector.broadcast %cst_50 : f32 to vector<8x1xf32>
    %106 = arith.mulf %105, %102 : vector<8x1xf32>
    %107 = arith.select %104, %102, %106 : vector<8x1xi1>, vector<8x1xf32>
    %cst_51 = arith.constant 5.000000e-01 : f32
    %108 = vector.broadcast %cst_51 : f32 to vector<8x2xf32>
    %109 = arith.cmpf ogt, %7, %108 : vector<8x2xf32>
    %cst_52 = arith.constant -1.000000e+30 : f32
    %110 = vector.shape_cast %107 : vector<8x1xf32> to vector<8x1xf32>
    %111 = vector.broadcast %110 : vector<8x1xf32> to vector<8x2xf32>
    %112 = vector.broadcast %cst_52 : f32 to vector<8x2xf32>
    %113 = arith.select %109, %111, %112 : vector<8x2xi1>, vector<8x2xf32>
    %cst_53 = arith.constant dense<0xFF800000> : vector<2xf32>
    %114 = vector.multi_reduction <maximumf>, %113, %cst_53 [0] : vector<8x2xf32> to vector<2xf32>
    %115 = vector.shape_cast %114 : vector<2xf32> to vector<1x2xf32>
    %116 = tpu.transpose %115, [1, 0] : vector<1x2xf32> -> vector<2x1xf32>
    %cst_54 = arith.constant dense<0.000000e+00> : vector<8x1xf32>
    %117 = tpu.matmul %7, %116, %cst_54 {dimension_numbers = #tpu.dot_dimension_numbers<[1], [0], [0], [1], [0, 0, 1, 1], [], []>} : vector<8x2xf32>, vector<2x1xf32>, vector<8x1xf32> -> vector<8x1xf32>
    %118 = arith.subf %107, %117 : vector<8x1xf32>
    %119 = math.exp %118 : vector<8x1xf32>
    %cst_55 = arith.constant dense<0.000000e+00> : vector<2x1xf32>
    %120 = tpu.matmul %12, %119, %cst_55 {dimension_numbers = #tpu.dot_dimension_numbers<[1], [0], [0], [1], [0, 0, 1, 1], [], []>} : vector<2x8xf32>, vector<8x1xf32>, vector<2x1xf32> -> vector<2x1xf32>
    %cst_56 = arith.constant dense<0.000000e+00> : vector<8x1xf32>
    %121 = tpu.matmul %7, %120, %cst_56 {dimension_numbers = #tpu.dot_dimension_numbers<[1], [0], [0], [1], [0, 0, 1, 1], [], []>} : vector<8x2xf32>, vector<2x1xf32>, vector<8x1xf32> -> vector<8x1xf32>
    %cst_57 = arith.constant 1.000000e-16 : f32
    %122 = vector.broadcast %cst_57 : f32 to vector<8x1xf32>
    %123 = arith.addf %121, %122 : vector<8x1xf32>
    %124 = arith.divf %119, %123 : vector<8x1xf32>
    %125 = vector.broadcast %124 : vector<8x1xf32> to vector<8x32xf32>
    %126 = arith.mulf %24, %125 : vector<8x32xf32>
    %cst_58 = arith.constant dense<0.000000e+00> : vector<2x32xf32>
    %127 = tpu.matmul %12, %126, %cst_58 {dimension_numbers = #tpu.dot_dimension_numbers<[1], [0], [0], [1], [0, 0, 1, 1], [], []>} : vector<2x8xf32>, vector<8x32xf32>, vector<2x32xf32> -> vector<2x32xf32>
    %128 = vector.broadcast %16 : vector<1x32xf32> to vector<2x32xf32>
    %129 = arith.addf %127, %128 : vector<2x32xf32>
    %cst_59 = arith.constant 0.000000e+00 : f32
    %130 = vector.broadcast %cst_59 : f32 to vector<2x32xf32>
    %131 = arith.cmpf ogt, %129, %130 : vector<2x32xf32>
    %cst_60 = arith.constant 0.000000e+00 : f32
    %132 = vector.broadcast %cst_60 : f32 to vector<2x32xf32>
    %133 = arith.minimumf %129, %132 : vector<2x32xf32>
    %134 = math.exp %133 : vector<2x32xf32>
    %cst_61 = arith.constant 1.000000e+00 : f32
    %135 = vector.broadcast %cst_61 : f32 to vector<2x32xf32>
    %136 = arith.subf %134, %135 : vector<2x32xf32>
    %137 = arith.select %131, %129, %136 : vector<2x32xi1>, vector<2x32xf32>
    %cst_62 = arith.constant dense<0.000000e+00> : vector<2x96xf32>
    %138 = tpu.matmul %137, %17, %cst_62 {dimension_numbers = #tpu.dot_dimension_numbers<[1], [0], [0], [1], [0, 0, 1, 1], [], []>} : vector<2x32xf32>, vector<32x96xf32>, vector<2x96xf32> -> vector<2x96xf32>
    %139 = vector.broadcast %19 : vector<1x96xf32> to vector<2x96xf32>
    %140 = arith.addf %138, %139 : vector<2x96xf32>
    %cst_63 = arith.constant dense<0.000000e+00> : vector<2x96xf32>
    %141 = tpu.matmul %98, %18, %cst_63 {dimension_numbers = #tpu.dot_dimension_numbers<[1], [0], [0], [1], [0, 0, 1, 1], [], []>} : vector<2x32xf32>, vector<32x96xf32>, vector<2x96xf32> -> vector<2x96xf32>
    %142 = vector.broadcast %20 : vector<1x96xf32> to vector<2x96xf32>
    %143 = arith.addf %141, %142 : vector<2x96xf32>
    %144 = vector.extract_strided_slice %140 {offsets = [0, 0], sizes = [2, 32], strides = [1, 1]} : vector<2x96xf32> to vector<2x32xf32>
    %145 = vector.extract_strided_slice %143 {offsets = [0, 0], sizes = [2, 32], strides = [1, 1]} : vector<2x96xf32> to vector<2x32xf32>
    %146 = arith.addf %144, %145 : vector<2x32xf32>
    %147 = arith.negf %146 : vector<2x32xf32>
    %148 = math.exp %147 : vector<2x32xf32>
    %cst_64 = arith.constant 1.000000e+00 : f32
    %149 = vector.broadcast %cst_64 : f32 to vector<2x32xf32>
    %150 = arith.addf %149, %148 : vector<2x32xf32>
    %151 = arith.divf %149, %150 : vector<2x32xf32>
    %152 = vector.extract_strided_slice %140 {offsets = [0, 32], sizes = [2, 32], strides = [1, 1]} : vector<2x96xf32> to vector<2x32xf32>
    %153 = vector.extract_strided_slice %143 {offsets = [0, 32], sizes = [2, 32], strides = [1, 1]} : vector<2x96xf32> to vector<2x32xf32>
    %154 = arith.addf %152, %153 : vector<2x32xf32>
    %155 = arith.negf %154 : vector<2x32xf32>
    %156 = math.exp %155 : vector<2x32xf32>
    %cst_65 = arith.constant 1.000000e+00 : f32
    %157 = vector.broadcast %cst_65 : f32 to vector<2x32xf32>
    %158 = arith.addf %157, %156 : vector<2x32xf32>
    %159 = arith.divf %157, %158 : vector<2x32xf32>
    %160 = vector.extract_strided_slice %140 {offsets = [0, 64], sizes = [2, 32], strides = [1, 1]} : vector<2x96xf32> to vector<2x32xf32>
    %161 = vector.extract_strided_slice %143 {offsets = [0, 64], sizes = [2, 32], strides = [1, 1]} : vector<2x96xf32> to vector<2x32xf32>
    %162 = arith.mulf %151, %161 : vector<2x32xf32>
    %163 = arith.addf %160, %162 : vector<2x32xf32>
    %164 = math.tanh %163 : vector<2x32xf32>
    %cst_66 = arith.constant 1.000000e+00 : f32
    %165 = vector.broadcast %cst_66 : f32 to vector<2x32xf32>
    %166 = arith.subf %165, %159 : vector<2x32xf32>
    %167 = arith.mulf %166, %164 : vector<2x32xf32>
    %168 = arith.mulf %159, %98 : vector<2x32xf32>
    %169 = arith.addf %167, %168 : vector<2x32xf32>
    %cst_67 = arith.constant 0.000000e+00 : f32
    %170 = vector.broadcast %cst_67 : f32 to vector<2x32xf32>
    %171 = arith.maximumf %169, %170 : vector<2x32xf32>
    %c0_68 = arith.constant 0 : index
    %c0_69 = arith.constant 0 : index
    %172 = vector.load %arg11[%c0_68, %c0_69] : memref<32x4xf32, #tpu.memory_space<vmem>>, vector<32x4xf32>
    %cst_70 = arith.constant dense<0.000000e+00> : vector<2x4xf32>
    %173 = tpu.matmul %171, %172, %cst_70 {dimension_numbers = #tpu.dot_dimension_numbers<[1], [0], [0], [1], [0, 0, 1, 1], [], []>} : vector<2x32xf32>, vector<32x4xf32>, vector<2x4xf32> -> vector<2x4xf32>
    %c0_71 = arith.constant 0 : index
    %c0_72 = arith.constant 0 : index
    %174 = vector.load %arg12[%c0_71, %c0_72] : memref<1x4xf32, #tpu.memory_space<vmem>>, vector<1x4xf32>
    %175 = vector.broadcast %174 : vector<1x4xf32> to vector<2x4xf32>
    %176 = arith.addf %173, %175 : vector<2x4xf32>
    %c0_73 = arith.constant 0 : index
    %c0_74 = arith.constant 0 : index
    %177 = vector.load %arg13[%c0_73, %c0_74] : memref<2x4xf32, #tpu.memory_space<vmem>>, vector<2x4xf32>
    tpu.vector_store %arg13[%c0_73, %c0_74], %176 {strides = array<i32>} : memref<2x4xf32, #tpu.memory_space<vmem>>, vector<2x4xf32>,
    return
  }
}

module attributes {stable_mosaic.version = 11 : i64} {
  func.func @gate_layer_kernel(%arg0: memref<8x16xf32, #tpu.memory_space<vmem>>, %arg1: memref<16x8xf32, #tpu.memory_space<vmem>>, %arg2: memref<16x1xi32, #tpu.memory_space<vmem>>, %arg3: memref<16x1xi32, #tpu.memory_space<vmem>>, %arg4: memref<1x16xi32, #tpu.memory_space<vmem>>, %arg5: memref<16x32xf32, #tpu.memory_space<vmem>>, %arg6: memref<1x32xf32, #tpu.memory_space<vmem>>, %arg7: memref<32x32xf32, #tpu.memory_space<vmem>>, %arg8: memref<8x32xf32, #tpu.memory_space<vmem>>, %arg9: memref<32x1xf32, #tpu.memory_space<vmem>>, %arg10: memref<32x1xf32, #tpu.memory_space<vmem>>, %arg11: memref<32x32xf32, #tpu.memory_space<vmem>>, %arg12: memref<1x32xf32, #tpu.memory_space<vmem>>, %arg13: memref<32x96xf32, #tpu.memory_space<vmem>>, %arg14: memref<32x96xf32, #tpu.memory_space<vmem>>, %arg15: memref<1x96xf32, #tpu.memory_space<vmem>>, %arg16: memref<1x96xf32, #tpu.memory_space<vmem>>, %arg17: memref<8x32xf32, #tpu.memory_space<vmem>>) attributes {dimension_semantics = [], scalar_prefetch = 0 : i64, scratch_operands = 0 : i64, tpu.core_type = #tpu.core_type<tc>} {
    %c0 = arith.constant 0 : index
    %c0_0 = arith.constant 0 : index
    %0 = vector.load %arg0[%c0, %c0_0] : memref<8x16xf32, #tpu.memory_space<vmem>>, vector<8x16xf32>
    %c0_1 = arith.constant 0 : index
    %c0_2 = arith.constant 0 : index
    %1 = vector.load %arg5[%c0_1, %c0_2] : memref<16x32xf32, #tpu.memory_space<vmem>>, vector<16x32xf32>
    %cst = arith.constant dense<0.000000e+00> : vector<8x32xf32>
    %2 = tpu.matmul %0, %1, %cst {dimension_numbers = #tpu.dot_dimension_numbers<[1], [0], [0], [1], [0, 0, 1, 1], [], []>} : vector<8x16xf32>, vector<16x32xf32>, vector<8x32xf32> -> vector<8x32xf32>
    %c0_3 = arith.constant 0 : index
    %c0_4 = arith.constant 0 : index
    %3 = vector.load %arg6[%c0_3, %c0_4] : memref<1x32xf32, #tpu.memory_space<vmem>>, vector<1x32xf32>
    %4 = vector.broadcast %3 : vector<1x32xf32> to vector<8x32xf32>
    %5 = arith.addf %2, %4 : vector<8x32xf32>
    %cst_5 = arith.constant 0.000000e+00 : f32
    %6 = vector.broadcast %cst_5 : f32 to vector<8x32xf32>
    %7 = arith.cmpf ogt, %5, %6 : vector<8x32xf32>
    %cst_6 = arith.constant 0.00999999977 : f32
    %8 = vector.broadcast %cst_6 : f32 to vector<8x32xf32>
    %9 = arith.mulf %8, %5 : vector<8x32xf32>
    %10 = arith.select %7, %5, %9 : vector<8x32xi1>, vector<8x32xf32>
    %c0_7 = arith.constant 0 : index
    %c0_8 = arith.constant 0 : index
    %11 = vector.load %arg2[%c0_7, %c0_8] : memref<16x1xi32, #tpu.memory_space<vmem>>, vector<16x1xi32>
    %12 = tpu.iota {dimensions = array<i32: 1>} : vector<16x8xi32>
    %13 = vector.broadcast %11 : vector<16x1xi32> to vector<16x8xi32>
    %14 = arith.cmpi eq, %13, %12 : vector<16x8xi32>
    %15 = arith.extui %14 : vector<16x8xi1> to vector<16x8xi32>
    %16 = arith.sitofp %15 : vector<16x8xi32> to vector<16x8xf32>
    %c0_9 = arith.constant 0 : index
    %c0_10 = arith.constant 0 : index
    %17 = vector.load %arg3[%c0_9, %c0_10] : memref<16x1xi32, #tpu.memory_space<vmem>>, vector<16x1xi32>
    %c0_11 = arith.constant 0 : index
    %c0_12 = arith.constant 0 : index
    %18 = vector.load %arg4[%c0_11, %c0_12] : memref<1x16xi32, #tpu.memory_space<vmem>>, vector<1x16xi32>
    %19 = tpu.iota {dimensions = array<i32: 1>} : vector<16x8xi32>
    %20 = vector.broadcast %17 : vector<16x1xi32> to vector<16x8xi32>
    %21 = arith.cmpi eq, %20, %19 : vector<16x8xi32>
    %22 = arith.extui %21 : vector<16x8xi1> to vector<16x8xi32>
    %23 = arith.sitofp %22 : vector<16x8xi32> to vector<16x8xf32>
    %24 = tpu.iota {dimensions = array<i32: 0>} : vector<8x16xi32>
    %25 = vector.broadcast %18 : vector<1x16xi32> to vector<8x16xi32>
    %26 = arith.cmpi eq, %25, %24 : vector<8x16xi32>
    %27 = arith.extui %26 : vector<8x16xi1> to vector<8x16xi32>
    %28 = arith.sitofp %27 : vector<8x16xi32> to vector<8x16xf32>
    %cst_13 = arith.constant dense<0.000000e+00> : vector<16x32xf32>
    %29 = tpu.matmul %16, %10, %cst_13 {dimension_numbers = #tpu.dot_dimension_numbers<[1], [0], [0], [1], [0, 0, 1, 1], [], []>} : vector<16x8xf32>, vector<8x32xf32>, vector<16x32xf32> -> vector<16x32xf32>
    %c0_14 = arith.constant 0 : index
    %c0_15 = arith.constant 0 : index
    %30 = vector.load %arg7[%c0_14, %c0_15] : memref<32x32xf32, #tpu.memory_space<vmem>>, vector<32x32xf32>
    %cst_16 = arith.constant dense<0.000000e+00> : vector<16x32xf32>
    %31 = tpu.matmul %29, %30, %cst_16 {dimension_numbers = #tpu.dot_dimension_numbers<[1], [0], [0], [1], [0, 0, 1, 1], [], []>} : vector<16x32xf32>, vector<32x32xf32>, vector<16x32xf32> -> vector<16x32xf32>
    %c0_17 = arith.constant 0 : index
    %c0_18 = arith.constant 0 : index
    %32 = vector.load %arg1[%c0_17, %c0_18] : memref<16x8xf32, #tpu.memory_space<vmem>>, vector<16x8xf32>
    %c0_19 = arith.constant 0 : index
    %c0_20 = arith.constant 0 : index
    %33 = vector.load %arg8[%c0_19, %c0_20] : memref<8x32xf32, #tpu.memory_space<vmem>>, vector<8x32xf32>
    %cst_21 = arith.constant dense<0.000000e+00> : vector<16x32xf32>
    %34 = tpu.matmul %32, %33, %cst_21 {dimension_numbers = #tpu.dot_dimension_numbers<[1], [0], [0], [1], [0, 0, 1, 1], [], []>} : vector<16x8xf32>, vector<8x32xf32>, vector<16x32xf32> -> vector<16x32xf32>
    %35 = arith.addf %31, %34 : vector<16x32xf32>
    %cst_22 = arith.constant 0.000000e+00 : f32
    %36 = vector.broadcast %cst_22 : f32 to vector<16x32xf32>
    %37 = arith.cmpf ogt, %35, %36 : vector<16x32xf32>
    %cst_23 = arith.constant 0.00999999977 : f32
    %38 = vector.broadcast %cst_23 : f32 to vector<16x32xf32>
    %39 = arith.mulf %38, %35 : vector<16x32xf32>
    %40 = arith.select %37, %35, %39 : vector<16x32xi1>, vector<16x32xf32>
    %c0_24 = arith.constant 0 : index
    %c0_25 = arith.constant 0 : index
    %41 = vector.load %arg10[%c0_24, %c0_25] : memref<32x1xf32, #tpu.memory_space<vmem>>, vector<32x1xf32>
    %cst_26 = arith.constant dense<0.000000e+00> : vector<8x1xf32>
    %42 = tpu.matmul %10, %41, %cst_26 {dimension_numbers = #tpu.dot_dimension_numbers<[1], [0], [0], [1], [0, 0, 1, 1], [], []>} : vector<8x32xf32>, vector<32x1xf32>, vector<8x1xf32> -> vector<8x1xf32>
    %c0_27 = arith.constant 0 : index
    %c0_28 = arith.constant 0 : index
    %43 = vector.load %arg9[%c0_27, %c0_28] : memref<32x1xf32, #tpu.memory_space<vmem>>, vector<32x1xf32>
    %cst_29 = arith.constant dense<0.000000e+00> : vector<16x1xf32>
    %44 = tpu.matmul %40, %43, %cst_29 {dimension_numbers = #tpu.dot_dimension_numbers<[1], [0], [0], [1], [0, 0, 1, 1], [], []>} : vector<16x32xf32>, vector<32x1xf32>, vector<16x1xf32> -> vector<16x1xf32>
    %cst_30 = arith.constant dense<0.000000e+00> : vector<16x1xf32>
    %45 = tpu.matmul %23, %42, %cst_30 {dimension_numbers = #tpu.dot_dimension_numbers<[1], [0], [0], [1], [0, 0, 1, 1], [], []>} : vector<16x8xf32>, vector<8x1xf32>, vector<16x1xf32> -> vector<16x1xf32>
    %46 = arith.addf %44, %45 : vector<16x1xf32>
    %cst_31 = arith.constant 0.000000e+00 : f32
    %47 = vector.broadcast %cst_31 : f32 to vector<16x1xf32>
    %48 = arith.cmpf ogt, %46, %47 : vector<16x1xf32>
    %cst_32 = arith.constant 0.00999999977 : f32
    %49 = vector.broadcast %cst_32 : f32 to vector<16x1xf32>
    %50 = arith.mulf %49, %46 : vector<16x1xf32>
    %51 = arith.select %48, %46, %50 : vector<16x1xi1>, vector<16x1xf32>
    %cst_33 = arith.constant 5.000000e-01 : f32
    %52 = vector.broadcast %cst_33 : f32 to vector<16x8xf32>
    %53 = arith.cmpf ogt, %23, %52 : vector<16x8xf32>
    %cst_34 = arith.constant -1.000000e+30 : f32
    %54 = vector.shape_cast %51 : vector<16x1xf32> to vector<16x1xf32>
    %55 = vector.broadcast %54 : vector<16x1xf32> to vector<16x8xf32>
    %56 = vector.broadcast %cst_34 : f32 to vector<16x8xf32>
    %57 = arith.select %53, %55, %56 : vector<16x8xi1>, vector<16x8xf32>
    %cst_35 = arith.constant dense<0xFF800000> : vector<8xf32>
    %58 = vector.multi_reduction <maximumf>, %57, %cst_35 [0] : vector<16x8xf32> to vector<8xf32>
    %59 = vector.shape_cast %58 : vector<8xf32> to vector<1x8xf32>
    %60 = tpu.transpose %59, [1, 0] : vector<1x8xf32> -> vector<8x1xf32>
    %cst_36 = arith.constant dense<0.000000e+00> : vector<16x1xf32>
    %61 = tpu.matmul %23, %60, %cst_36 {dimension_numbers = #tpu.dot_dimension_numbers<[1], [0], [0], [1], [0, 0, 1, 1], [], []>} : vector<16x8xf32>, vector<8x1xf32>, vector<16x1xf32> -> vector<16x1xf32>
    %62 = arith.subf %51, %61 : vector<16x1xf32>
    %63 = math.exp %62 : vector<16x1xf32>
    %cst_37 = arith.constant dense<0.000000e+00> : vector<8x1xf32>
    %64 = tpu.matmul %28, %63, %cst_37 {dimension_numbers = #tpu.dot_dimension_numbers<[1], [0], [0], [1], [0, 0, 1, 1], [], []>} : vector<8x16xf32>, vector<16x1xf32>, vector<8x1xf32> -> vector<8x1xf32>
    %cst_38 = arith.constant dense<0.000000e+00> : vector<16x1xf32>
    %65 = tpu.matmul %23, %64, %cst_38 {dimension_numbers = #tpu.dot_dimension_numbers<[1], [0], [0], [1], [0, 0, 1, 1], [], []>} : vector<16x8xf32>, vector<8x1xf32>, vector<16x1xf32> -> vector<16x1xf32>
    %cst_39 = arith.constant 1.000000e-16 : f32
    %66 = vector.broadcast %cst_39 : f32 to vector<16x1xf32>
    %67 = arith.addf %65, %66 : vector<16x1xf32>
    %68 = arith.divf %63, %67 : vector<16x1xf32>
    %c0_40 = arith.constant 0 : index
    %c0_41 = arith.constant 0 : index
    %69 = vector.load %arg11[%c0_40, %c0_41] : memref<32x32xf32, #tpu.memory_space<vmem>>, vector<32x32xf32>
    %cst_42 = arith.constant dense<0.000000e+00> : vector<16x32xf32>
    %70 = tpu.matmul %40, %69, %cst_42 {dimension_numbers = #tpu.dot_dimension_numbers<[1], [0], [0], [1], [0, 0, 1, 1], [], []>} : vector<16x32xf32>, vector<32x32xf32>, vector<16x32xf32> -> vector<16x32xf32>
    %71 = vector.broadcast %68 : vector<16x1xf32> to vector<16x32xf32>
    %72 = arith.mulf %70, %71 : vector<16x32xf32>
    %cst_43 = arith.constant dense<0.000000e+00> : vector<8x32xf32>
    %73 = tpu.matmul %28, %72, %cst_43 {dimension_numbers = #tpu.dot_dimension_numbers<[1], [0], [0], [1], [0, 0, 1, 1], [], []>} : vector<8x16xf32>, vector<16x32xf32>, vector<8x32xf32> -> vector<8x32xf32>
    %c0_44 = arith.constant 0 : index
    %c0_45 = arith.constant 0 : index
    %74 = vector.load %arg12[%c0_44, %c0_45] : memref<1x32xf32, #tpu.memory_space<vmem>>, vector<1x32xf32>
    %75 = vector.broadcast %74 : vector<1x32xf32> to vector<8x32xf32>
    %76 = arith.addf %73, %75 : vector<8x32xf32>
    %cst_46 = arith.constant 0.000000e+00 : f32
    %77 = vector.broadcast %cst_46 : f32 to vector<8x32xf32>
    %78 = arith.cmpf ogt, %76, %77 : vector<8x32xf32>
    %cst_47 = arith.constant 0.000000e+00 : f32
    %79 = vector.broadcast %cst_47 : f32 to vector<8x32xf32>
    %80 = arith.minimumf %76, %79 : vector<8x32xf32>
    %81 = math.exp %80 : vector<8x32xf32>
    %cst_48 = arith.constant 1.000000e+00 : f32
    %82 = vector.broadcast %cst_48 : f32 to vector<8x32xf32>
    %83 = arith.subf %81, %82 : vector<8x32xf32>
    %84 = arith.select %78, %76, %83 : vector<8x32xi1>, vector<8x32xf32>
    %c0_49 = arith.constant 0 : index
    %c0_50 = arith.constant 0 : index
    %85 = vector.load %arg13[%c0_49, %c0_50] : memref<32x96xf32, #tpu.memory_space<vmem>>, vector<32x96xf32>
    %c0_51 = arith.constant 0 : index
    %c0_52 = arith.constant 0 : index
    %86 = vector.load %arg14[%c0_51, %c0_52] : memref<32x96xf32, #tpu.memory_space<vmem>>, vector<32x96xf32>
    %c0_53 = arith.constant 0 : index
    %c0_54 = arith.constant 0 : index
    %87 = vector.load %arg15[%c0_53, %c0_54] : memref<1x96xf32, #tpu.memory_space<vmem>>, vector<1x96xf32>
    %c0_55 = arith.constant 0 : index
    %c0_56 = arith.constant 0 : index
    %88 = vector.load %arg16[%c0_55, %c0_56] : memref<1x96xf32, #tpu.memory_space<vmem>>, vector<1x96xf32>
    %cst_57 = arith.constant dense<0.000000e+00> : vector<8x96xf32>
    %89 = tpu.matmul %84, %85, %cst_57 {dimension_numbers = #tpu.dot_dimension_numbers<[1], [0], [0], [1], [0, 0, 1, 1], [], []>} : vector<8x32xf32>, vector<32x96xf32>, vector<8x96xf32> -> vector<8x96xf32>
    %90 = vector.broadcast %87 : vector<1x96xf32> to vector<8x96xf32>
    %91 = arith.addf %89, %90 : vector<8x96xf32>
    %cst_58 = arith.constant dense<0.000000e+00> : vector<8x96xf32>
    %92 = tpu.matmul %10, %86, %cst_58 {dimension_numbers = #tpu.dot_dimension_numbers<[1], [0], [0], [1], [0, 0, 1, 1], [], []>} : vector<8x32xf32>, vector<32x96xf32>, vector<8x96xf32> -> vector<8x96xf32>
    %93 = vector.broadcast %88 : vector<1x96xf32> to vector<8x96xf32>
    %94 = arith.addf %92, %93 : vector<8x96xf32>
    %95 = vector.extract_strided_slice %91 {offsets = [0, 0], sizes = [8, 32], strides = [1, 1]} : vector<8x96xf32> to vector<8x32xf32>
    %96 = vector.extract_strided_slice %94 {offsets = [0, 0], sizes = [8, 32], strides = [1, 1]} : vector<8x96xf32> to vector<8x32xf32>
    %97 = arith.addf %95, %96 : vector<8x32xf32>
    %98 = arith.negf %97 : vector<8x32xf32>
    %99 = math.exp %98 : vector<8x32xf32>
    %cst_59 = arith.constant 1.000000e+00 : f32
    %100 = vector.broadcast %cst_59 : f32 to vector<8x32xf32>
    %101 = arith.addf %100, %99 : vector<8x32xf32>
    %102 = arith.divf %100, %101 : vector<8x32xf32>
    %103 = vector.extract_strided_slice %91 {offsets = [0, 32], sizes = [8, 32], strides = [1, 1]} : vector<8x96xf32> to vector<8x32xf32>
    %104 = vector.extract_strided_slice %94 {offsets = [0, 32], sizes = [8, 32], strides = [1, 1]} : vector<8x96xf32> to vector<8x32xf32>
    %105 = arith.addf %103, %104 : vector<8x32xf32>
    %106 = arith.negf %105 : vector<8x32xf32>
    %107 = math.exp %106 : vector<8x32xf32>
    %cst_60 = arith.constant 1.000000e+00 : f32
    %108 = vector.broadcast %cst_60 : f32 to vector<8x32xf32>
    %109 = arith.addf %108, %107 : vector<8x32xf32>
    %110 = arith.divf %108, %109 : vector<8x32xf32>
    %111 = vector.extract_strided_slice %91 {offsets = [0, 64], sizes = [8, 32], strides = [1, 1]} : vector<8x96xf32> to vector<8x32xf32>
    %112 = vector.extract_strided_slice %94 {offsets = [0, 64], sizes = [8, 32], strides = [1, 1]} : vector<8x96xf32> to vector<8x32xf32>
    %113 = arith.mulf %102, %112 : vector<8x32xf32>
    %114 = arith.addf %111, %113 : vector<8x32xf32>
    %115 = math.tanh %114 : vector<8x32xf32>
    %cst_61 = arith.constant 1.000000e+00 : f32
    %116 = vector.broadcast %cst_61 : f32 to vector<8x32xf32>
    %117 = arith.subf %116, %110 : vector<8x32xf32>
    %118 = arith.mulf %117, %115 : vector<8x32xf32>
    %119 = arith.mulf %110, %10 : vector<8x32xf32>
    %120 = arith.addf %118, %119 : vector<8x32xf32>
    %cst_62 = arith.constant 0.000000e+00 : f32
    %121 = vector.broadcast %cst_62 : f32 to vector<8x32xf32>
    %122 = arith.maximumf %120, %121 : vector<8x32xf32>
    %c0_63 = arith.constant 0 : index
    %c0_64 = arith.constant 0 : index
    %123 = vector.load %arg17[%c0_63, %c0_64] : memref<8x32xf32, #tpu.memory_space<vmem>>, vector<8x32xf32>
    tpu.vector_store %arg17[%c0_63, %c0_64], %122 {strides = array<i32>} : memref<8x32xf32, #tpu.memory_space<vmem>>, vector<8x32xf32>,
    return
  }
}

module attributes {stable_mosaic.version = 11 : i64} {
  func.func @atom_layers_kernel(%arg0: i32, %arg1: memref<8x32xf32, #tpu.memory_space<vmem>>, %arg2: memref<16x1xi32, #tpu.memory_space<vmem>>, %arg3: memref<16x1xi32, #tpu.memory_space<vmem>>, %arg4: memref<1x16xi32, #tpu.memory_space<vmem>>, %arg5: memref<1x32x32xf32, #tpu.memory_space<vmem>>, %arg6: memref<1x32x2xf32, #tpu.memory_space<vmem>>, %arg7: memref<1x1x32xf32, #tpu.memory_space<vmem>>, %arg8: memref<1x32x96xf32, #tpu.memory_space<vmem>>, %arg9: memref<1x32x96xf32, #tpu.memory_space<vmem>>, %arg10: memref<1x1x96xf32, #tpu.memory_space<vmem>>, %arg11: memref<1x1x96xf32, #tpu.memory_space<vmem>>, %arg12: memref<8x32xf32, #tpu.memory_space<vmem>>) attributes {dimension_semantics = [#tpu.dimension_semantics<arbitrary>], iteration_bounds = array<i64: 1>, scalar_prefetch = 0 : i64, scratch_operands = 0 : i64, tpu.core_type = #tpu.core_type<tc>, window_params = [{pipeline_mode = #tpu.pipeline_mode<synchronous>, transform_indices = @transform_0, window_bounds = array<i64: 8, 32>}, {pipeline_mode = #tpu.pipeline_mode<synchronous>, transform_indices = @transform_1, window_bounds = array<i64: 16, 1>}, {pipeline_mode = #tpu.pipeline_mode<synchronous>, transform_indices = @transform_2, window_bounds = array<i64: 16, 1>}, {pipeline_mode = #tpu.pipeline_mode<synchronous>, transform_indices = @transform_3, window_bounds = array<i64: 1, 16>}, {transform_indices = @transform_4, window_bounds = array<i64: 1, 32, 32>}, {transform_indices = @transform_5, window_bounds = array<i64: 1, 32, 2>}, {transform_indices = @transform_6, window_bounds = array<i64: 1, 1, 32>}, {transform_indices = @transform_7, window_bounds = array<i64: 1, 32, 96>}, {transform_indices = @transform_8, window_bounds = array<i64: 1, 32, 96>}, {transform_indices = @transform_9, window_bounds = array<i64: 1, 1, 96>}, {transform_indices = @transform_10, window_bounds = array<i64: 1, 1, 96>}, {pipeline_mode = #tpu.pipeline_mode<synchronous>, transform_indices = @transform_11, window_bounds = array<i64: 8, 32>}]} {
    %c0_i32 = arith.constant 0 : i32
    %0 = arith.cmpi eq, %arg0, %c0_i32 : i32
    %1 = arith.extui %0 : i1 to i32
    %c0_i32_0 = arith.constant 0 : i32
    %2 = arith.cmpi ne, %1, %c0_i32_0 : i32
    scf.if %2 {
      %c0_54 = arith.constant 0 : index
      %c0_55 = arith.constant 0 : index
      %114 = vector.load %arg1[%c0_54, %c0_55] : memref<8x32xf32, #tpu.memory_space<vmem>>, vector<8x32xf32>
      %c0_56 = arith.constant 0 : index
      %c0_57 = arith.constant 0 : index
      %115 = vector.load %arg12[%c0_56, %c0_57] : memref<8x32xf32, #tpu.memory_space<vmem>>, vector<8x32xf32>
      tpu.vector_store %arg12[%c0_56, %c0_57], %114 {strides = array<i32>} : memref<8x32xf32, #tpu.memory_space<vmem>>, vector<8x32xf32>,
    } else {
    }
    %c0 = arith.constant 0 : index
    %c0_1 = arith.constant 0 : index
    %3 = vector.load %arg12[%c0, %c0_1] : memref<8x32xf32, #tpu.memory_space<vmem>>, vector<8x32xf32>
    %c0_2 = arith.constant 0 : index
    %c0_3 = arith.constant 0 : index
    %4 = vector.load %arg2[%c0_2, %c0_3] : memref<16x1xi32, #tpu.memory_space<vmem>>, vector<16x1xi32>
    %5 = tpu.iota {dimensions = array<i32: 1>} : vector<16x8xi32>
    %6 = vector.broadcast %4 : vector<16x1xi32> to vector<16x8xi32>
    %7 = arith.cmpi eq, %6, %5 : vector<16x8xi32>
    %8 = arith.extui %7 : vector<16x8xi1> to vector<16x8xi32>
    %9 = arith.sitofp %8 : vector<16x8xi32> to vector<16x8xf32>
    %c0_4 = arith.constant 0 : index
    %c0_5 = arith.constant 0 : index
    %10 = vector.load %arg3[%c0_4, %c0_5] : memref<16x1xi32, #tpu.memory_space<vmem>>, vector<16x1xi32>
    %c0_6 = arith.constant 0 : index
    %c0_7 = arith.constant 0 : index
    %11 = vector.load %arg4[%c0_6, %c0_7] : memref<1x16xi32, #tpu.memory_space<vmem>>, vector<1x16xi32>
    %12 = tpu.iota {dimensions = array<i32: 1>} : vector<16x8xi32>
    %13 = vector.broadcast %10 : vector<16x1xi32> to vector<16x8xi32>
    %14 = arith.cmpi eq, %13, %12 : vector<16x8xi32>
    %15 = arith.extui %14 : vector<16x8xi1> to vector<16x8xi32>
    %16 = arith.sitofp %15 : vector<16x8xi32> to vector<16x8xf32>
    %17 = tpu.iota {dimensions = array<i32: 0>} : vector<8x16xi32>
    %18 = vector.broadcast %11 : vector<1x16xi32> to vector<8x16xi32>
    %19 = arith.cmpi eq, %18, %17 : vector<8x16xi32>
    %20 = arith.extui %19 : vector<8x16xi1> to vector<8x16xi32>
    %21 = arith.sitofp %20 : vector<8x16xi32> to vector<8x16xf32>
    %c0_8 = arith.constant 0 : index
    %c0_9 = arith.constant 0 : index
    %c0_10 = arith.constant 0 : index
    %22 = vector.load %arg5[%c0_8, %c0_9, %c0_10] : memref<1x32x32xf32, #tpu.memory_space<vmem>>, vector<1x32x32xf32>
    %23 = vector.shape_cast %22 : vector<1x32x32xf32> to vector<32x32xf32>
    %c0_11 = arith.constant 0 : index
    %c0_12 = arith.constant 0 : index
    %c0_13 = arith.constant 0 : index
    %24 = vector.load %arg6[%c0_11, %c0_12, %c0_13] : memref<1x32x2xf32, #tpu.memory_space<vmem>>, vector<1x32x2xf32>
    %25 = vector.shape_cast %24 : vector<1x32x2xf32> to vector<32x2xf32>
    %c0_14 = arith.constant 0 : index
    %c0_15 = arith.constant 0 : index
    %c0_16 = arith.constant 0 : index
    %26 = vector.load %arg7[%c0_14, %c0_15, %c0_16] : memref<1x1x32xf32, #tpu.memory_space<vmem>>, vector<1x1x32xf32>
    %27 = vector.shape_cast %26 : vector<1x1x32xf32> to vector<1x32xf32>
    %cst = arith.constant dense<0.000000e+00> : vector<8x32xf32>
    %28 = tpu.matmul %3, %23, %cst {dimension_numbers = #tpu.dot_dimension_numbers<[1], [0], [0], [1], [0, 0, 1, 1], [], []>} : vector<8x32xf32>, vector<32x32xf32>, vector<8x32xf32> -> vector<8x32xf32>
    %cst_17 = arith.constant dense<0.000000e+00> : vector<8x2xf32>
    %29 = tpu.matmul %28, %25, %cst_17 {dimension_numbers = #tpu.dot_dimension_numbers<[1], [0], [0], [1], [0, 0, 1, 1], [], []>} : vector<8x32xf32>, vector<32x2xf32>, vector<8x2xf32> -> vector<8x2xf32>
    %30 = vector.extract_strided_slice %29 {offsets = [0, 0], sizes = [8, 1], strides = [1, 1]} : vector<8x2xf32> to vector<8x1xf32>
    %cst_18 = arith.constant dense<0.000000e+00> : vector<16x1xf32>
    %31 = tpu.matmul %9, %30, %cst_18 {dimension_numbers = #tpu.dot_dimension_numbers<[1], [0], [0], [1], [0, 0, 1, 1], [], []>} : vector<16x8xf32>, vector<8x1xf32>, vector<16x1xf32> -> vector<16x1xf32>
    %32 = vector.extract_strided_slice %29 {offsets = [0, 1], sizes = [8, 1], strides = [1, 1]} : vector<8x2xf32> to vector<8x1xf32>
    %cst_19 = arith.constant dense<0.000000e+00> : vector<16x1xf32>
    %33 = tpu.matmul %16, %32, %cst_19 {dimension_numbers = #tpu.dot_dimension_numbers<[1], [0], [0], [1], [0, 0, 1, 1], [], []>} : vector<16x8xf32>, vector<8x1xf32>, vector<16x1xf32> -> vector<16x1xf32>
    %34 = arith.addf %31, %33 : vector<16x1xf32>
    %cst_20 = arith.constant 0.000000e+00 : f32
    %35 = vector.broadcast %cst_20 : f32 to vector<16x1xf32>
    %36 = arith.cmpf ogt, %34, %35 : vector<16x1xf32>
    %cst_21 = arith.constant 0.00999999977 : f32
    %37 = vector.broadcast %cst_21 : f32 to vector<16x1xf32>
    %38 = arith.mulf %37, %34 : vector<16x1xf32>
    %39 = arith.select %36, %34, %38 : vector<16x1xi1>, vector<16x1xf32>
    %cst_22 = arith.constant 5.000000e-01 : f32
    %40 = vector.broadcast %cst_22 : f32 to vector<16x8xf32>
    %41 = arith.cmpf ogt, %16, %40 : vector<16x8xf32>
    %cst_23 = arith.constant -1.000000e+30 : f32
    %42 = vector.shape_cast %39 : vector<16x1xf32> to vector<16x1xf32>
    %43 = vector.broadcast %42 : vector<16x1xf32> to vector<16x8xf32>
    %44 = vector.broadcast %cst_23 : f32 to vector<16x8xf32>
    %45 = arith.select %41, %43, %44 : vector<16x8xi1>, vector<16x8xf32>
    %cst_24 = arith.constant dense<0xFF800000> : vector<8xf32>
    %46 = vector.multi_reduction <maximumf>, %45, %cst_24 [0] : vector<16x8xf32> to vector<8xf32>
    %47 = vector.shape_cast %46 : vector<8xf32> to vector<1x8xf32>
    %48 = tpu.transpose %47, [1, 0] : vector<1x8xf32> -> vector<8x1xf32>
    %cst_25 = arith.constant dense<0.000000e+00> : vector<16x1xf32>
    %49 = tpu.matmul %16, %48, %cst_25 {dimension_numbers = #tpu.dot_dimension_numbers<[1], [0], [0], [1], [0, 0, 1, 1], [], []>} : vector<16x8xf32>, vector<8x1xf32>, vector<16x1xf32> -> vector<16x1xf32>
    %50 = arith.subf %39, %49 : vector<16x1xf32>
    %51 = math.exp %50 : vector<16x1xf32>
    %cst_26 = arith.constant dense<0.000000e+00> : vector<8x1xf32>
    %52 = tpu.matmul %21, %51, %cst_26 {dimension_numbers = #tpu.dot_dimension_numbers<[1], [0], [0], [1], [0, 0, 1, 1], [], []>} : vector<8x16xf32>, vector<16x1xf32>, vector<8x1xf32> -> vector<8x1xf32>
    %cst_27 = arith.constant dense<0.000000e+00> : vector<16x1xf32>
    %53 = tpu.matmul %16, %52, %cst_27 {dimension_numbers = #tpu.dot_dimension_numbers<[1], [0], [0], [1], [0, 0, 1, 1], [], []>} : vector<16x8xf32>, vector<8x1xf32>, vector<16x1xf32> -> vector<16x1xf32>
    %cst_28 = arith.constant 1.000000e-16 : f32
    %54 = vector.broadcast %cst_28 : f32 to vector<16x1xf32>
    %55 = arith.addf %53, %54 : vector<16x1xf32>
    %56 = arith.divf %51, %55 : vector<16x1xf32>
    %cst_29 = arith.constant dense<0.000000e+00> : vector<16x32xf32>
    %57 = tpu.matmul %9, %28, %cst_29 {dimension_numbers = #tpu.dot_dimension_numbers<[1], [0], [0], [1], [0, 0, 1, 1], [], []>} : vector<16x8xf32>, vector<8x32xf32>, vector<16x32xf32> -> vector<16x32xf32>
    %58 = vector.broadcast %56 : vector<16x1xf32> to vector<16x32xf32>
    %59 = arith.mulf %57, %58 : vector<16x32xf32>
    %cst_30 = arith.constant dense<0.000000e+00> : vector<8x32xf32>
    %60 = tpu.matmul %21, %59, %cst_30 {dimension_numbers = #tpu.dot_dimension_numbers<[1], [0], [0], [1], [0, 0, 1, 1], [], []>} : vector<8x16xf32>, vector<16x32xf32>, vector<8x32xf32> -> vector<8x32xf32>
    %61 = vector.broadcast %27 : vector<1x32xf32> to vector<8x32xf32>
    %62 = arith.addf %60, %61 : vector<8x32xf32>
    %cst_31 = arith.constant 0.000000e+00 : f32
    %63 = vector.broadcast %cst_31 : f32 to vector<8x32xf32>
    %64 = arith.cmpf ogt, %62, %63 : vector<8x32xf32>
    %cst_32 = arith.constant 0.000000e+00 : f32
    %65 = vector.broadcast %cst_32 : f32 to vector<8x32xf32>
    %66 = arith.minimumf %62, %65 : vector<8x32xf32>
    %67 = math.exp %66 : vector<8x32xf32>
    %cst_33 = arith.constant 1.000000e+00 : f32
    %68 = vector.broadcast %cst_33 : f32 to vector<8x32xf32>
    %69 = arith.subf %67, %68 : vector<8x32xf32>
    %70 = arith.select %64, %62, %69 : vector<8x32xi1>, vector<8x32xf32>
    %c0_34 = arith.constant 0 : index
    %c0_35 = arith.constant 0 : index
    %c0_36 = arith.constant 0 : index
    %71 = vector.load %arg8[%c0_34, %c0_35, %c0_36] : memref<1x32x96xf32, #tpu.memory_space<vmem>>, vector<1x32x96xf32>
    %72 = vector.shape_cast %71 : vector<1x32x96xf32> to vector<32x96xf32>
    %c0_37 = arith.constant 0 : index
    %c0_38 = arith.constant 0 : index
    %c0_39 = arith.constant 0 : index
    %73 = vector.load %arg9[%c0_37, %c0_38, %c0_39] : memref<1x32x96xf32, #tpu.memory_space<vmem>>, vector<1x32x96xf32>
    %74 = vector.shape_cast %73 : vector<1x32x96xf32> to vector<32x96xf32>
    %c0_40 = arith.constant 0 : index
    %c0_41 = arith.constant 0 : index
    %c0_42 = arith.constant 0 : index
    %75 = vector.load %arg10[%c0_40, %c0_41, %c0_42] : memref<1x1x96xf32, #tpu.memory_space<vmem>>, vector<1x1x96xf32>
    %76 = vector.shape_cast %75 : vector<1x1x96xf32> to vector<1x96xf32>
    %c0_43 = arith.constant 0 : index
    %c0_44 = arith.constant 0 : index
    %c0_45 = arith.constant 0 : index
    %77 = vector.load %arg11[%c0_43, %c0_44, %c0_45] : memref<1x1x96xf32, #tpu.memory_space<vmem>>, vector<1x1x96xf32>
    %78 = vector.shape_cast %77 : vector<1x1x96xf32> to vector<1x96xf32>
    %cst_46 = arith.constant dense<0.000000e+00> : vector<8x96xf32>
    %79 = tpu.matmul %70, %72, %cst_46 {dimension_numbers = #tpu.dot_dimension_numbers<[1], [0], [0], [1], [0, 0, 1, 1], [], []>} : vector<8x32xf32>, vector<32x96xf32>, vector<8x96xf32> -> vector<8x96xf32>
    %80 = vector.broadcast %76 : vector<1x96xf32> to vector<8x96xf32>
    %81 = arith.addf %79, %80 : vector<8x96xf32>
    %cst_47 = arith.constant dense<0.000000e+00> : vector<8x96xf32>
    %82 = tpu.matmul %3, %74, %cst_47 {dimension_numbers = #tpu.dot_dimension_numbers<[1], [0], [0], [1], [0, 0, 1, 1], [], []>} : vector<8x32xf32>, vector<32x96xf32>, vector<8x96xf32> -> vector<8x96xf32>
    %83 = vector.broadcast %78 : vector<1x96xf32> to vector<8x96xf32>
    %84 = arith.addf %82, %83 : vector<8x96xf32>
    %85 = vector.extract_strided_slice %81 {offsets = [0, 0], sizes = [8, 32], strides = [1, 1]} : vector<8x96xf32> to vector<8x32xf32>
    %86 = vector.extract_strided_slice %84 {offsets = [0, 0], sizes = [8, 32], strides = [1, 1]} : vector<8x96xf32> to vector<8x32xf32>
    %87 = arith.addf %85, %86 : vector<8x32xf32>
    %88 = arith.negf %87 : vector<8x32xf32>
    %89 = math.exp %88 : vector<8x32xf32>
    %cst_48 = arith.constant 1.000000e+00 : f32
    %90 = vector.broadcast %cst_48 : f32 to vector<8x32xf32>
    %91 = arith.addf %90, %89 : vector<8x32xf32>
    %92 = arith.divf %90, %91 : vector<8x32xf32>
    %93 = vector.extract_strided_slice %81 {offsets = [0, 32], sizes = [8, 32], strides = [1, 1]} : vector<8x96xf32> to vector<8x32xf32>
    %94 = vector.extract_strided_slice %84 {offsets = [0, 32], sizes = [8, 32], strides = [1, 1]} : vector<8x96xf32> to vector<8x32xf32>
    %95 = arith.addf %93, %94 : vector<8x32xf32>
    %96 = arith.negf %95 : vector<8x32xf32>
    %97 = math.exp %96 : vector<8x32xf32>
    %cst_49 = arith.constant 1.000000e+00 : f32
    %98 = vector.broadcast %cst_49 : f32 to vector<8x32xf32>
    %99 = arith.addf %98, %97 : vector<8x32xf32>
    %100 = arith.divf %98, %99 : vector<8x32xf32>
    %101 = vector.extract_strided_slice %81 {offsets = [0, 64], sizes = [8, 32], strides = [1, 1]} : vector<8x96xf32> to vector<8x32xf32>
    %102 = vector.extract_strided_slice %84 {offsets = [0, 64], sizes = [8, 32], strides = [1, 1]} : vector<8x96xf32> to vector<8x32xf32>
    %103 = arith.mulf %92, %102 : vector<8x32xf32>
    %104 = arith.addf %101, %103 : vector<8x32xf32>
    %105 = math.tanh %104 : vector<8x32xf32>
    %cst_50 = arith.constant 1.000000e+00 : f32
    %106 = vector.broadcast %cst_50 : f32 to vector<8x32xf32>
    %107 = arith.subf %106, %100 : vector<8x32xf32>
    %108 = arith.mulf %107, %105 : vector<8x32xf32>
    %109 = arith.mulf %100, %3 : vector<8x32xf32>
    %110 = arith.addf %108, %109 : vector<8x32xf32>
    %cst_51 = arith.constant 0.000000e+00 : f32
    %111 = vector.broadcast %cst_51 : f32 to vector<8x32xf32>
    %112 = arith.maximumf %110, %111 : vector<8x32xf32>
    %c0_52 = arith.constant 0 : index
    %c0_53 = arith.constant 0 : index
    %113 = vector.load %arg12[%c0_52, %c0_53] : memref<8x32xf32, #tpu.memory_space<vmem>>, vector<8x32xf32>
    tpu.vector_store %arg12[%c0_52, %c0_53], %112 {strides = array<i32>} : memref<8x32xf32, #tpu.memory_space<vmem>>, vector<8x32xf32>,
    return
  }
  func.func @transform_0(%arg0: i32) -> (i32, i32) {
    %c0_i32 = arith.constant 0 : i32
    %c0_i32_0 = arith.constant 0 : i32
    %c0_i32_1 = arith.constant 0 : i32
    return %c0_i32, %c0_i32_0 : i32, i32
  }
  func.func @transform_1(%arg0: i32) -> (i32, i32) {
    %c0_i32 = arith.constant 0 : i32
    %c0_i32_0 = arith.constant 0 : i32
    %c0_i32_1 = arith.constant 0 : i32
    return %c0_i32, %c0_i32_0 : i32, i32
  }
  func.func @transform_2(%arg0: i32) -> (i32, i32) {
    %c0_i32 = arith.constant 0 : i32
    %c0_i32_0 = arith.constant 0 : i32
    %c0_i32_1 = arith.constant 0 : i32
    return %c0_i32, %c0_i32_0 : i32, i32
  }
  func.func @transform_3(%arg0: i32) -> (i32, i32) {
    %c0_i32 = arith.constant 0 : i32
    %c0_i32_0 = arith.constant 0 : i32
    %c0_i32_1 = arith.constant 0 : i32
    return %c0_i32, %c0_i32_0 : i32, i32
  }
  func.func @transform_4(%arg0: i32) -> (i32, i32, i32) {
    %c0_i32 = arith.constant 0 : i32
    %c0_i32_0 = arith.constant 0 : i32
    %c0_i32_1 = arith.constant 0 : i32
    return %arg0, %c0_i32, %c0_i32_0 : i32, i32, i32
  }
  func.func @transform_5(%arg0: i32) -> (i32, i32, i32) {
    %c0_i32 = arith.constant 0 : i32
    %c0_i32_0 = arith.constant 0 : i32
    %c0_i32_1 = arith.constant 0 : i32
    return %arg0, %c0_i32, %c0_i32_0 : i32, i32, i32
  }
  func.func @transform_6(%arg0: i32) -> (i32, i32, i32) {
    %c0_i32 = arith.constant 0 : i32
    %c0_i32_0 = arith.constant 0 : i32
    %c0_i32_1 = arith.constant 0 : i32
    return %arg0, %c0_i32, %c0_i32_0 : i32, i32, i32
  }
  func.func @transform_7(%arg0: i32) -> (i32, i32, i32) {
    %c0_i32 = arith.constant 0 : i32
    %c0_i32_0 = arith.constant 0 : i32
    %c0_i32_1 = arith.constant 0 : i32
    return %arg0, %c0_i32, %c0_i32_0 : i32, i32, i32
  }
  func.func @transform_8(%arg0: i32) -> (i32, i32, i32) {
    %c0_i32 = arith.constant 0 : i32
    %c0_i32_0 = arith.constant 0 : i32
    %c0_i32_1 = arith.constant 0 : i32
    return %arg0, %c0_i32, %c0_i32_0 : i32, i32, i32
  }
  func.func @transform_9(%arg0: i32) -> (i32, i32, i32) {
    %c0_i32 = arith.constant 0 : i32
    %c0_i32_0 = arith.constant 0 : i32
    %c0_i32_1 = arith.constant 0 : i32
    return %arg0, %c0_i32, %c0_i32_0 : i32, i32, i32
  }
  func.func @transform_10(%arg0: i32) -> (i32, i32, i32) {
    %c0_i32 = arith.constant 0 : i32
    %c0_i32_0 = arith.constant 0 : i32
    %c0_i32_1 = arith.constant 0 : i32
    return %arg0, %c0_i32, %c0_i32_0 : i32, i32, i32
  }
  func.func @transform_11(%arg0: i32) -> (i32, i32) {
    %c0_i32 = arith.constant 0 : i32
    %c0_i32_0 = arith.constant 0 : i32
    %c0_i32_1 = arith.constant 0 : i32
    return %c0_i32, %c0_i32_0 : i32, i32
  }
}

</mosaic_0001>

<bundles_post_ra>
// kernel: attentive_fp_forward.4
= control target key start
LH: loop header
LB: loop body
LE: loop exit
PB: predicated region body
PF: predicated region fallthrough
CT: control target
= control target key end

     0   :  { %16 = vsyncpa [#allocation3], 0  ;;  %s858_s0 = inlined_call_operand.vmem [shape: f32[8,32], index: 0, kind: input, shape index: {}]   ;;  %s859_s1 = inlined_call_operand.vmem [shape: s32[16,1], index: 1, kind: input, shape index: {}]   ;;  %s860_s2 = inlined_call_operand.vmem [shape: s32[16,1], index: 2, kind: input, shape index: {}]   ;;  %s861_s3 = inlined_call_operand.vmem [shape: s32[1,16], index: 3, kind: input, shape index: {}]   ;;  %s862_s4 = inlined_call_operand.vmem [shape: f32[1,32,32], index: 4, kind: input, shape index: {}]   ;;  %s863_s5 = inlined_call_operand.vmem [shape: f32[1,32,2], index: 5, kind: input, shape index: {}]   ;;  %s864_s6 = inlined_call_operand.vmem [shape: f32[1,1,32], index: 6, kind: input, shape index: {}]   ;;  %s865_s7 = inlined_call_operand.hbm [shape: f32[1,32,96], index: 7, kind: input, shape index: {}]   ;;  %s866_s8 = inlined_call_operand.hbm [shape: f32[1,32,96], index: 8, kind: input, shape index: {}]   ;;  %s867_s9 = inlined_call_operand.hbm [shape: f32[1,1,96], index: 9, kind: input, shape index: {}]   ;;  %s868_s10 = inlined_call_operand.vmem [shape: f32[1,1,96], index: 10, kind: input, shape index: {}]   ;;  %s869_s11 = inlined_call_operand.vmem [shape: f32[8,32], index: 11, kind: output, shape index: {}]  }
   0x1   :  { %17 = vsyncpa [#allocation5], 0  ;;  %s49_s19 = sshll.u32 %s866_s8, 4  ;;  %s675_s20 = smov [#allocation4]   ;;  %s50_s19 = int_to_ptr.hbm [resolvable:$true] %s49_s19 }
   0x2   :  { %s51_s21 = sshll.u32 %s675_s20, 4  ;;  %s36_s24 = sshll.u32 %s865_s7, 4  ;;  %s52_s21 = int_to_ptr.vmem [resolvable:$true] %s51_s21  ;;  %s37_s24 = int_to_ptr.hbm [resolvable:$true] %s36_s24 }
   0x3   :  { %s676_s25 = smov 128   ;;  %s677_s26 = smov 8  }
   0x4   :  { %57 = dma.hbm_to_vmem [thread:$0]  %s50_s19, 512, %s52_s21, [#allocation5], %s676_s25, %s676_s25, %s677_s26  }
   0x5   :  { %s678_s27 = smov [#allocation2]   ;;  %s63_s12 = sshll.u32 %s867_s9, 4  ;;  %s64_s12 = int_to_ptr.hbm [resolvable:$true] %s63_s12 }
   0x6   :  { %s38_s28 = sshll.u32 %s678_s27, 4  ;;  %s679_s8 = smov [#allocation6]   ;;  %s39_s28 = int_to_ptr.vmem [resolvable:$true] %s38_s28 }
   0x7   :  { %44 = dma.hbm_to_vmem [thread:$0]  %s37_s24, 512, %s39_s28, [#allocation3], %s676_s25, %s676_s25, %s677_s26  }
   0x8   :  { %s65_s13 = sshll.u32 %s679_s8, 4  ;;  %s66_s13 = int_to_ptr.vmem [resolvable:$true] %s65_s13 }
   0x9   :  { %68 = dma.hbm_to_vmem [thread:$0]  %s64_s12, 16, %s66_s13, [#allocation5]  }
   0xa   :  { %671 = dma.done.wait [#allocation3], 512  }
   0xb   :  { %672 = vsyncadd [#allocation3], 4294966784 }
   0xc   :  { %673 = dma.done.wait [#allocation5], 528  }
   0xd   :  { %674 = vsyncadd [#allocation5], 4294966768  ;;  %vm88_vm0 = vcmask 261120   ;;  %v131_v0 = vld [vmem:[%s862_s4 + $0x18] sm:$0xff]  ;;  %v130_v1 = vld [vmem:[%s862_s4 + $0x10] sm:$0xff]  ;;  %v680_v11 = vmov 0   ;;  %v93_v15 = vlaneseq }
   0xe   :  { %153 = vmatpush.msra.mxu0 %v131_v0  ;;  %v129_v2 = vld [vmem:[%s862_s4 + $0x8] sm:$0xff]  ;;  %v87_v3 = vld [vmem:[%s858_s0] sm:$0xff]  ;;  %v135_v4 = vld [vmem:[%s863_s5 + $0x18] sm:$0xff]  ;;  %576 = vset.pattern.permute.xlu0 %v680_v11  ;;  %v681_v18 = vmov 0.0   ;;  %vm188_vm2 = vcmask 64512   ;;  %s682_s16 = smov 127  }
   0xf   :  { %89 = vst.msk [vmem:[%s869_s11] sm:$0xff] %vm88_vm0, %v87_v3  ;;  %176 = vmatpush.msra.mxu1 %v135_v4  ;;  %v134_v5 = vld [vmem:[%s863_s5 + $0x10] sm:$0xff]  ;;  %v133_v6 = vld [vmem:[%s863_s5 + $0x8] sm:$0xff]  ;;  %v128_v7 = vld [vmem:[%s862_s4] sm:$0xff]  ;;  %577 = vset.pattern.permute.xlu1 %v680_v11  ;;  %v94_v16 = vand.u32 127, %v93_v15  ;;  %v123_v62 = vshrl.u32 %v93_v15, 7 }
  0x10   :  { %154 = vmatpush.msra.mxu0 %v130_v1  ;;  %v132_v9 = vld [vmem:[%s863_s5] sm:$0xff]  ;;  %578 = vset.pattern.permute.xlu2 %v680_v11  ;;  %v108_v14 = vld [vmem:[%s860_s2 + $0x8] sm:$0xff]  ;;  %vm290_vm11 = vcmask 130048   ;;  %s684_s22 = smov 64  }
  0x11   :  { %177 = vmatpush.msra.mxu1 %v134_v5  ;;  %v91_v10 = vld [vmem:[%s859_s1] sm:$0xff]  ;;  %114 = vperm.xlu2 %578, %v108_v14   ;;  %v92_v21 = vld [vmem:[%s859_s1 + $0x8] sm:$0xff] }
  0x12   :  { %155 = vmatpush.msra.mxu0 %v129_v2  ;;  %96 = vperm.xlu0 %576, %v91_v10   ;;  %v107_v12 = vld [vmem:[%s860_s2] sm:$0xff] }
  0x13   :  { %178 = vmatpush.msra.mxu1 %v133_v6  ;;  %v579_v63 = vld [vmem:[%s861_s3] ss:$0 sm:$0xff]  ;;  %s683_s3 = smov 32  }
  0x14   :  { %156 = vmatpush.msra.mxu0 %v128_v7  ;;  %vm125_vm10 = vcmp.eq.s32.totalorder %v579_v63, %v123_v62 }
  0x15   :  { %179 = vmatpush.msra.mxu1 %v132_v9  ;;  %v548_v1 = vsel %vm125_vm10, 1.0, %v681_v18 }
  0x16   :  { %v786_v8 = vld [vmem:[%s869_s11] sm:$0xff] }
  0x17   :  { %549 = vmatmul.msk.f32.vlgmr.msra.gmra.mxu0 %vm88_vm0, %v786_v8 }
  0x1a   :  { %111 = vperm.xlu0 %576, %v107_v12  }
  0x6b   :  { %v115_v25 = vpop.permute.xlu2 %114 }
  0x6c   :  { %vm117_vm4 = vcmp.eq.s32.totalorder %v115_v25, %v94_v16 }
  0x6d   :  { %v815_v26 = vsel %vm117_vm4, 1.0, %v681_v18 }
  0x6e   :  { %vm254_vm9 = vcmp.gt.f32.partialorder %v815_v26, 0.5 }
  0x84   :  { %v97_v17 = vpop.permute.xlu0 %96 }
  0x85   :  { %vm101_vm1 = vcmp.eq.s32.totalorder %v97_v17, %v94_v16 }
  0x86   :  { %v544_v19 = vsel %vm101_vm1, 1.0, %v681_v18 }
  0x8c   :  { %v112_v22 = vpop.permute.xlu0 %111 }
  0x8d   :  { %vm116_vm3 = vcmp.eq.s32.totalorder %v112_v22, %v94_v16 }
  0x8e   :  { %v810_v24 = vsel %vm116_vm3, 1.0, %v681_v18 }
  0x8f   :  { %vm253_vm8 = vcmp.gt.f32.partialorder %v810_v24, 0.5 }
  0x94   :  { %v158_v13 = vpop.f32.mrf.mxu0 }
  0x95   :  { %550 = vmatmul.msk.f32.vlgmr.msra.gmra.mxu1 %vm88_vm0, %v158_v13 }
 0x112   :  { %v181_v20 = vpop.f32.mrf.mxu1 }
 0x113   :  { %185 = vrot.lane.b32.xlu1 %v181_v20, %s682_s16  ;;  %239 = vmatpush.msra.mxu3 %v181_v20 }
 0x114   :  { %553 = vmatmul.msk.f32.vlgmr.msra.gmra.mxu3 %vm188_vm2, %v544_v19 }
 0x11b   :  { %99 = vperm.xlu1 %577, %v92_v21  }
 0x185   :  { %v186_v23 = vpop.permute.xlu1 %185 }
 0x186   :  { %210 = vmatpush.msra.mxu2 %v186_v23 }
 0x187   :  { %551 = vmatmul.msk.f32.vlgmr.msra.gmra.mxu2 %vm188_vm2, %v810_v24 }
 0x188   :  { %382 = vmatpush.msrb.mxu2 %v158_v13 }
 0x18d   :  { %v100_v27 = vpop.permute.xlu1 %99 }
 0x18e   :  { %vm102_vm5 = vcmp.eq.s32.totalorder %v100_v27, %v94_v16 }
 0x18f   :  { %v545_v28 = vsel %vm102_vm5, 1.0, %v681_v18  ;;  %552 = vmatmul.msk.f32.gmra.mxu2 %vm188_vm2, %v815_v26 }
 0x190   :  { %554 = vmatmul.msk.f32.gmra.mxu3 %vm188_vm2, %v545_v28 }
 0x197   :  { %558 = vmatmul.msk.f32.vlgmr.msrb.gmra.mxu2 %vm188_vm2, %v544_v19  ;;  %v241_v29 = vpop.f32.mrf.mxu3 }
 0x19f   :  { %559 = vmatmul.msk.f32.gmra.mxu2 %vm188_vm2, %v545_v28 }
 0x20a   :  { %v212_v30 = vpop.f32.mrf.mxu2 }
 0x20b   :  { %v242_v31 = vadd.f32 %v241_v29, %v212_v30 }
 0x20d   :  { %v249_v32 = vmul.f32 0.01, %v242_v31  ;;  %vm247_vm6 = vcmp.gt.f32.partialorder %v242_v31, 0.0 }
 0x20f   :  { %v251_v33 = vsel %vm247_vm6, %v242_v31, %v249_v32 }
 0x210   :  { %257 = vperm.xlu2 %578, %v251_v33  }
 0x212   :  { %v215_v34 = vpop.f32.mrf.mxu2 }
 0x213   :  { %v244_v35 = vpop.f32.mrf.mxu3 }
 0x214   :  { %v245_v36 = vadd.f32 %v244_v35, %v215_v34 }
 0x216   :  { %v250_v37 = vmul.f32 0.01, %v245_v36  ;;  %vm248_vm7 = vcmp.gt.f32.partialorder %v245_v36, 0.0 }
 0x218   :  { %v252_v38 = vsel %vm248_vm7, %v245_v36, %v250_v37  ;;  %v438_v37 = vld [vmem:[#allocation4 + $0x18] sm:$0xff] }
 0x219   :  { %262 = vperm.xlu0 %576, %v252_v38  }
 0x21a   :  { %v384_v31 = vpop.f32.mrf.mxu2 }
 0x222   :  { %v387_v32 = vpop.f32.mrf.mxu2 }
 0x26a   :  { %v258_v39 = vpop.permute.xlu2 %257 }
 0x26b   :  { %v265_v40 = vsel %vm253_vm8, %v258_v39, -1e+30  ;;  %v436_v39 = vld [vmem:[#allocation4 + $0x8] sm:$0xff] }
 0x26c   :  { %v267_v43 = vsel %vm188_vm2, %v265_v40, -inf  ;;  %v435_v40 = vld [vmem:[#allocation4] sm:$0xff] }
 0x28b   :  { %v263_v41 = vpop.permute.xlu0 %262 }
 0x28c   :  { %v266_v42 = vsel %vm254_vm9, %v263_v41, -1e+30  ;;  %v434_v41 = vld [vmem:[#allocation2 + $0x18] sm:$0xff] }
 0x28d   :  { %v268_v44 = vsel %vm188_vm2, %v266_v42, -inf  ;;  %v433_v42 = vld [vmem:[#allocation2 + $0x10] sm:$0xff] }
 0x28e   :  { %v269_v45 = vmax.f32 %v267_v43, %v268_v44  ;;  %v432_v43 = vld [vmem:[#allocation2 + $0x8] sm:$0xff]  ;;  %v431_v44 = vld [vmem:[#allocation2] sm:$0xff] }
 0x290   :  { %v270_v46 = vrot.slane %v269_v45, 4 }
 0x292   :  { %v271_v47 = vmax.f32 %v269_v45, %v270_v46  ;;  %v580_v45 = vld [vmem:[%s864_s6] ss:$0 sm:$0xff]  ;;  %s685_s6 = smov 96  }
 0x294   :  { %v272_v48 = vrot.slane %v271_v47, 2 }
 0x296   :  { %v273_v49 = vmax.f32 %v271_v47, %v272_v48 }
 0x298   :  { %v274_v50 = vrot.slane %v273_v49, 1 }
 0x29a   :  { %v275_v51 = vmax.f32 %v273_v49, %v274_v50 }
 0x29c   :  { %v277_v52 = vmul.f32 %v815_v26, %v275_v51  ;;  %v276_v53 = vmul.f32 %v810_v24, %v275_v51 }
 0x29e   :  { %v281_v54 = vsel %vm188_vm2, %v277_v52, 0.0  ;;  %v278_v55 = vsel %vm188_vm2, %v276_v53, 0.0 }
 0x29f   :  { %282 = vadd.xlane.f32.xlu1 %v281_v54  ;;  %279 = vadd.xlane.f32.xlu2 %v278_v55  ;;  %v582_v55 = vld [vmem:[#allocation6] ss:$0 sm:$0xff] }
 0x2b7   :  { %527 = vrot.lane.b32.xlu2 %v786_v8, %s683_s3 }
 0x312   :  { %v283_v56 = vpop.xlane.xlu1 %282  ;;  %v280_v57 = vpop.xlane.xlu2 %279 }
 0x313   :  { %v285_v58 = vsub.f32 %v252_v38, %v283_v56  ;;  %v284_v59 = vsub.f32 %v251_v33, %v280_v57  ;;  %v437_v38 = vld [vmem:[#allocation4 + $0x10] sm:$0xff] }
 0x315   :  { %v288_v60 = vmul.f32 1.442695, %v285_v58  ;;  %v286_v61 = vmul.f32 1.442695, %v284_v59 }
 0x317   :  { %583 = vpow2.f32 %v288_v60 }
 0x318   :  { %585 = vpow2.f32 %v286_v61 }
 0x31d   :  { %v584_v0 = vpop.eup %583 }
 0x31e   :  { %308 = vmatpush.msrb.mxu0 %v584_v0  ;;  %v586_v2 = vpop.eup %585 }
 0x320   :  { %309 = vmatpush.msrb.mxu0 %v586_v2 }
 0x321   :  { %555 = vmatmul.msk.f32.vlgmr.msrb.gmra.mxu0 %vm290_vm11, %v548_v1 }
 0x322   :  { %459 = vmatpush.msra.mxu0 %v434_v41 }
 0x324   :  { %460 = vmatpush.msra.mxu0 %v433_v42 }
 0x326   :  { %461 = vmatpush.msra.mxu0 %v432_v43 }
 0x328   :  { %462 = vmatpush.msra.mxu0 %v431_v44 }
 0x39e   :  { %v311_v3 = vpop.f32.mrf.mxu0 }
 0x39f   :  { %329 = vmatpush.msrb.mxu1 %v311_v3 }
 0x3a0   :  { %556 = vmatmul.msk.f32.vlgmr.msrb.gmra.mxu1 %vm188_vm2, %v810_v24 }
 0x3a8   :  { %557 = vmatmul.msk.f32.gmra.mxu1 %vm188_vm2, %v815_v26 }
 0x41d   :  { %v331_v4 = vpop.f32.mrf.mxu1 }
 0x41e   :  { %v332_v5 = vadd.f32 1e-16, %v331_v4 }
 0x420   :  { %587 = vrcp.f32 %v332_v5  ;;  %v348_v24 = vand.u32 2147483648, %v332_v5  ;;  %vm342_vm2 = vweird.f32 %v332_v5  ;;  %v346_v26 = vand.u32 2147483647, %v332_v5 }
 0x422   :  { %v349_v28 = vor.u32 1.1754944e-38, %v348_v24  ;;  %vm347_vm4 = vcmp.eq.f32.partialorder %v346_v26, 8.507059e+37 }
 0x425   :  { %v334_v6 = vpop.f32.mrf.mxu1 }
 0x426   :  { %v335_v7 = vadd.f32 1e-16, %v334_v6  ;;  %v588_v9 = vpop.eup %587 }
 0x427   :  { %v338_v10 = vmul.f32 %v588_v9, %v332_v5  ;;  %vm343_vm1 = vweird.f32 %v588_v9 }
 0x428   :  { %589 = vrcp.f32 %v335_v7  ;;  %v363_v15 = vand.u32 2147483648, %v335_v7  ;;  %v361_v17 = vand.u32 2147483647, %v335_v7  ;;  %vm357_vm13 = vweird.f32 %v335_v7  ;;  %vm344_vm3 = vmor %vm342_vm2, %vm343_vm1 }
 0x429   :  { %v339_v12 = vsub.f32 1.0, %v338_v10 }
 0x42a   :  { %v364_v20 = vor.u32 1.1754944e-38, %v363_v15  ;;  %vm362_vm15 = vcmp.eq.f32.partialorder %v361_v17, 8.507059e+37 }
 0x42b   :  { %v340_v18 = vmul.f32 %v588_v9, %v339_v12 }
 0x42d   :  { %v341_v22 = vadd.f32 %v588_v9, %v340_v18 }
 0x42e   :  { %v590_v11 = vpop.eup %589 }
 0x42f   :  { %v353_v13 = vmul.f32 %v590_v11, %v335_v7  ;;  %vm358_vm12 = vweird.f32 %v590_v11  ;;  %v345_v27 = vsel %vm344_vm3, %v588_v9, %v341_v22 }
 0x430   :  { %vm359_vm14 = vmor %vm357_vm13, %vm358_vm12  ;;  %v350_v29 = vsel %vm347_vm4, %v349_v28, %v345_v27 }
 0x431   :  { %v354_v14 = vsub.f32 1.0, %v353_v13  ;;  %v351_v30 = vmul.f32 %v586_v2, %v350_v29 }
 0x433   :  { %v355_v16 = vmul.f32 %v590_v11, %v354_v14  ;;  %v528_v14 = vpop.permute.xlu2 %527 }
 0x435   :  { %v356_v19 = vadd.f32 %v590_v11, %v355_v16 }
 0x437   :  { %v360_v21 = vsel %vm359_vm14, %v590_v11, %v356_v19 }
 0x438   :  { %v365_v23 = vsel %vm362_vm15, %v364_v20, %v360_v21 }
 0x439   :  { %v366_v25 = vmul.f32 %v584_v0, %v365_v23 }
 0x43b   :  { %397 = vperm.xlu0 %576, %v366_v25  }
 0x443   :  { %392 = vperm.xlu0 %576, %v351_v30  }
 0x4ad   :  { %v398_v33 = vpop.permute.xlu0 %397 }
 0x4ae   :  { %v401_v34 = vmul.f32 %v398_v33, %v387_v32 }
 0x4b0   :  { %419 = vmatpush.msrb.mxu3 %v401_v34 }
 0x4b5   :  { %v393_v35 = vpop.permute.xlu0 %392 }
 0x4b6   :  { %v400_v36 = vmul.f32 %v393_v35, %v384_v31 }
 0x4b8   :  { %420 = vmatpush.msrb.mxu3 %v400_v36 }
 0x4b9   :  { %560 = vmatmul.msk.f32.vlgmr.msrb.gmra.mxu3 %vm290_vm11, %v548_v1 }
 0x4ba   :  { %482 = vmatpush.msra.mxu3 %v438_v37 }
 0x4bc   :  { %483 = vmatpush.msra.mxu3 %v437_v38 }
 0x4be   :  { %484 = vmatpush.msra.mxu3 %v436_v39 }
 0x4c0   :  { %485 = vmatpush.msra.mxu3 %v435_v40 }
 0x4c1   :  { %563 = vmatmul.msk.f32.vlgmr.msra.gmra.mxu3 %vm88_vm0, %v786_v8  ;;  %v581_v8 = vld [vmem:[%s868_s10] ss:$0 sm:$0xff] }
 0x53c   :  { %v422_v46 = vpop.f32.mrf.mxu3 }
 0x53d   :  { %v423_v47 = vadd.f32 %v580_v45, %v422_v46 }
 0x53f   :  { %v426_v48 = vmin.f32 %v423_v47, 0.0  ;;  %vm425_vm5 = vcmp.gt.f32.partialorder %v423_v47, 0.0 }
 0x541   :  { %v427_v49 = vmul.f32 1.442695, %v426_v48 }
 0x543   :  { %591 = vpow2.f32 %v427_v49 }
 0x544   :  { %v487_v50 = vpop.f32.mrf.mxu3 }
 0x545   :  { %v488_v51 = vadd.f32 %v581_v8, %v487_v50 }
 0x547   :  { %511 = vrot.lane.b32.xlu0 %v488_v51, %s684_s22 }
 0x549   :  { %v592_v52 = vpop.eup %591 }
 0x54a   :  { %v561_v53 = vadd.f32 -1.0, %v592_v52 }
 0x54c   :  { %v430_v54 = vsel %vm425_vm5, %v423_v47, %v561_v53 }
 0x54d   :  { %562 = vmatmul.msk.f32.vlgmr.msra.gmra.mxu0 %vm88_vm0, %v430_v54 }
 0x5b9   :  { %v512_v5 = vpop.permute.xlu0 %511 }
 0x5ca   :  { %v464_v56 = vpop.f32.mrf.mxu0 }
 0x5cb   :  { %v465_v57 = vadd.f32 %v582_v55, %v464_v56 }
 0x5cd   :  { %v490_v58 = vadd.f32 %v488_v51, %v465_v57 }
 0x5cf   :  { %v564_v59 = vmul.f32 -1.442695, %v490_v58 }
 0x5d1   :  { %593 = vpow2.f32 %v564_v59 }
 0x5d7   :  { %v594_v60 = vpop.eup %593 }
 0x5d8   :  { %v494_v61 = vadd.f32 1.0, %v594_v60 }
 0x5da   :  { %595 = vrcp.f32 %v494_v61  ;;  %v506_v1 = vand.u32 2147483648, %v494_v61  ;;  %v504_v3 = vand.u32 2147483647, %v494_v61  ;;  %vm500_vm7 = vweird.f32 %v494_v61 }
 0x5dc   :  { %v507_v6 = vor.u32 1.1754944e-38, %v506_v1  ;;  %vm505_vm9 = vcmp.eq.f32.partialorder %v504_v3, 8.507059e+37 }
 0x5e0   :  { %v596_v62 = vpop.eup %595 }
 0x5e1   :  { %v496_v63 = vmul.f32 %v596_v62, %v494_v61  ;;  %vm501_vm6 = vweird.f32 %v596_v62 }
 0x5e2   :  { %vm502_vm8 = vmor %vm500_vm7, %vm501_vm6 }
 0x5e3   :  { %v497_v0 = vsub.f32 1.0, %v496_v63 }
 0x5e5   :  { %v498_v2 = vmul.f32 %v596_v62, %v497_v0 }
 0x5e7   :  { %v499_v4 = vadd.f32 %v596_v62, %v498_v2 }
 0x5e9   :  { %v503_v7 = vsel %vm502_vm8, %v596_v62, %v499_v4 }
 0x5ea   :  { %v508_v9 = vsel %vm505_vm9, %v507_v6, %v503_v7 }
 0x5eb   :  { %v514_v10 = vmul.f32 %v512_v5, %v508_v9  ;;  %v521_v15 = vsub.f32 1.0, %v508_v9  ;;  %v530_v17 = vmul.f32 %v528_v14, %v508_v9 }
 0x5ed   :  { %516 = vrot.lane.b32.xlu0 %v514_v10, %s684_s22 }
 0x65f   :  { %v517_v11 = vpop.permute.xlu0 %516 }
 0x660   :  { %v519_v12 = vadd.f32 %v517_v11, %v465_v57 }
 0x662   :  { %597 = vtanh.f32 %v519_v12 }
 0x668   :  { %v598_v13 = vpop.eup %597 }
 0x669   :  { %523 = vrot.lane.b32.xlu0 %v598_v13, %s685_s6 }
 0x6db   :  { %v524_v16 = vpop.permute.xlu0 %523 }
 0x6dc   :  { %v526_v18 = vmul.f32 %v524_v16, %v521_v15 }
 0x6de   :  { %v531_v19 = vadd.f32 %v530_v17, %v526_v18 }
 0x6e0   :  { %v532_v20 = vmax.f32 %v531_v19, 0.0 }
 0x6e2   :  { %534 = vrot.lane.b32.xlu1 %v532_v20, %s685_s6 }
 0x754   :  { %v535_v21 = vpop.permute.xlu1 %534 }
 0x755   :  { %537 = vst.msk [vmem:[%s869_s11] sm:$0xff] %vm88_vm0, %v535_v21 }
 0x756   :  { %542 = vsyncpa [#allocation3], 1 }
 0x757   :  { %543 = vsyncpa [#allocation5], 1 }

// kernel: attentive_fp_forward.3
= control target key start
LH: loop header
LB: loop body
LE: loop exit
PB: predicated region body
PF: predicated region fallthrough
CT: control target
= control target key end

     0   :  { %s996_s0 = inlined_call_operand.vmem [shape: f32[8,16], index: 0, kind: input, shape index: {}]   ;;  %s997_s1 = inlined_call_operand.vmem [shape: f32[16,8], index: 1, kind: input, shape index: {}]   ;;  %s998_s2 = inlined_call_operand.vmem [shape: s32[16,1], index: 2, kind: input, shape index: {}]   ;;  %s999_s3 = inlined_call_operand.vmem [shape: s32[16,1], index: 3, kind: input, shape index: {}]   ;;  %s1000_s4 = inlined_call_operand.vmem [shape: s32[1,16], index: 4, kind: input, shape index: {}]   ;;  %s1001_s5 = inlined_call_operand.vmem [shape: f32[16,32], index: 5, kind: input, shape index: {}]   ;;  %s1002_s6 = inlined_call_operand.vmem [shape: f32[1,32], index: 6, kind: input, shape index: {}]   ;;  %s1003_s7 = inlined_call_operand.vmem [shape: f32[32,32], index: 7, kind: input, shape index: {}]   ;;  %s1004_s8 = inlined_call_operand.vmem [shape: f32[8,32], index: 8, kind: input, shape index: {}]   ;;  %s1005_s9 = inlined_call_operand.vmem [shape: f32[32,1], index: 9, kind: input, shape index: {}]   ;;  %s1006_s10 = inlined_call_operand.vmem [shape: f32[32,1], index: 10, kind: input, shape index: {}]   ;;  %s1007_s11 = inlined_call_operand.vmem [shape: f32[32,32], index: 11, kind: input, shape index: {}]   ;;  %s1008_s12 = inlined_call_operand.vmem [shape: f32[1,32], index: 12, kind: input, shape index: {}]   ;;  %s1009_s13 = inlined_call_operand.vmem [shape: f32[32,96], index: 13, kind: input, shape index: {}]   ;;  %s1010_s14 = inlined_call_operand.hbm [shape: f32[32,96], index: 14, kind: input, shape index: {}]   ;;  %s1011_s15 = inlined_call_operand.vmem [shape: f32[1,96], index: 15, kind: input, shape index: {}]   ;;  %s1012_s16 = inlined_call_operand.vmem [shape: f32[1,96], index: 16, kind: input, shape index: {}]   ;;  %s1013_s17 = inlined_call_operand.vmem [shape: f32[8,32], index: 17, kind: output, shape index: {}]  }
   0x1   :  { %1015 = sst [smem:[#allocation5_spill]] %s996_s0 }
   0x2   :  { %1016 = sst [smem:[#allocation6_spill]] %s997_s1 }
   0x3   :  { %22 = vsyncpa [#allocation3], 0  ;;  %s55_s26 = sshll.u32 %s1010_s14, 4  ;;  %s719_s27 = smov [#allocation2]   ;;  %s56_s26 = int_to_ptr.hbm [resolvable:$true] %s55_s26 }
   0x4   :  { %s57_s28 = sshll.u32 %s719_s27, 4  ;;  %s720_s29 = smov 128   ;;  %s58_s28 = int_to_ptr.vmem [resolvable:$true] %s57_s28 }
   0x5   :  { %s721_s0 = smov 8  }
   0x6   :  { %63 = dma.hbm_to_vmem [thread:$0]  %s56_s26, 512, %s58_s28, [#allocation3], %s720_s29, %s720_s29, %s721_s0  }
   0x7   :  { %717 = dma.done.wait [#allocation3], 512  }
   0x8   :  { %718 = vsyncadd [#allocation3], 4294966784  ;;  %v722_v0 = vmov 0   ;;  %v74_v1 = vld [vmem:[%s1001_s5 + $0x8] sm:$0xff]  ;;  %v73_v2 = vld [vmem:[%s1001_s5] sm:$0xff]  ;;  %s1017_s21 = sld [smem:[#allocation5_spill]]  ;;  %v108_v13 = vlaneseq }
   0x9   :  { %669 = vset.pattern.permute.xlu0 %v722_v0  ;;  %670 = vset.pattern.permute.xlu1 %v722_v0  ;;  %vm79_vm0 = vcmask 130048   ;;  %v106_v4 = vld [vmem:[%s998_s2] sm:$0xff]  ;;  %v107_v5 = vld [vmem:[%s998_s2 + $0x8] sm:$0xff]  ;;  %v248_v6 = vld [vmem:[%s1006_s10 + $0x18] sm:$0xff]  ;;  %vm209_vm3 = vcmask 261120   ;;  %v723_v20 = vmov 0.0  }
   0xa   :  { %671 = vset.pattern.permute.xlu2 %v722_v0  ;;  %97 = vmatpush.msra.mxu0 %v74_v1  ;;  %v247_v7 = vld [vmem:[%s1006_s10 + $0x10] sm:$0xff]  ;;  %v246_v8 = vld [vmem:[%s1006_s10 + $0x8] sm:$0xff]  ;;  %v245_v9 = vld [vmem:[%s1006_s10] sm:$0xff]  ;;  %v109_v14 = vand.u32 127, %v108_v13  ;;  %vm143_vm4 = vcmask 64512   ;;  %s1018_s27 = sld [smem:[#allocation6_spill]] }
   0xb   :  { %111 = vperm.xlu0 %669, %v106_v4   ;;  %v176_v10 = vld [vmem:[%s1003_s7 + $0x18] sm:$0xff]  ;;  %v175_v11 = vld [vmem:[%s1003_s7 + $0x10] sm:$0xff]  ;;  %v174_v12 = vld [vmem:[%s1003_s7 + $0x8] sm:$0xff]  ;;  %s724_s28 = smov 64  }
   0xc   :  { %98 = vmatpush.msra.mxu0 %v73_v2  ;;  %228 = vmatpush.msra.mxu3 %v176_v10  ;;  %v672_v15 = vld [vmem:[%s1002_s6] ss:$0 sm:$0xff]  ;;  %v275_v30 = vld [vmem:[%s1005_s9 + $0x18] sm:$0xff]  ;;  %v123_v31 = vld [vmem:[%s999_s3 + $0x8] sm:$0xff] }
   0xd   :  { %v179_v25 = vld [vmem:[%s1004_s8] sm:$0xff]  ;;  %v274_v35 = vld [vmem:[%s1005_s9 + $0x10] sm:$0xff]  ;;  %v273_v37 = vld [vmem:[%s1005_s9 + $0x8] sm:$0xff] }
   0xe   :  { %v72_v3 = vld [vmem:[%s1017_s21] sm:$0xff]  ;;  %264 = vmatpush.msrb.mxu0 %v248_v6  ;;  %229 = vmatpush.msra.mxu3 %v175_v11 }
   0xf   :  { %634 = vmatmul.msk.f32.vlgmr.msra.gmra.mxu0 %vm79_vm0, %v72_v3  ;;  %v173_v26 = vld [vmem:[%s1003_s7] sm:$0xff]  ;;  %201 = vmatpush.msra.mxu2 %v179_v25 }
  0x10   :  { %265 = vmatpush.msrb.mxu0 %v247_v7  ;;  %230 = vmatpush.msra.mxu3 %v174_v12  ;;  %v177_v27 = vld [vmem:[%s1018_s27] sm:$0xff]  ;;  %v178_v28 = vld [vmem:[%s1018_s27 + $0x8] sm:$0xff] }
  0x11   :  { %642 = vmatmul.msk.f32.vlgmr.msra.gmra.mxu2 %vm143_vm4, %v177_v27  ;;  %v122_v29 = vld [vmem:[%s999_s3] sm:$0xff] }
  0x12   :  { %266 = vmatpush.msrb.mxu0 %v246_v8  ;;  %231 = vmatpush.msra.mxu3 %v173_v26  ;;  %v272_v39 = vld [vmem:[%s1005_s9] sm:$0xff] }
  0x13   :  { %114 = vperm.xlu0 %669, %v107_v5   ;;  %126 = vperm.xlu1 %670, %v122_v29   ;;  %v673_v25 = vld [vmem:[%s1000_s4] ss:$0 sm:$0xff]  ;;  %v456_v29 = vld [vmem:[%s1007_s11 + $0x18] sm:$0xff] }
  0x14   :  { %267 = vmatpush.msrb.mxu0 %v245_v9  ;;  %323 = vmatpush.msrb.mxu2 %v275_v30  ;;  %v453_v30 = vld [vmem:[%s1007_s11] sm:$0xff] }
  0x16   :  { %324 = vmatpush.msrb.mxu2 %v274_v35  ;;  %v526_v35 = vld [vmem:[#allocation2] sm:$0xff] }
  0x18   :  { %325 = vmatpush.msrb.mxu2 %v273_v37 }
  0x19   :  { %643 = vmatmul.msk.f32.gmra.mxu2 %vm143_vm4, %v178_v28 }
  0x1a   :  { %326 = vmatpush.msrb.mxu2 %v272_v39 }
  0x1b   :  { %129 = vperm.xlu1 %670, %v123_v31  }
  0x7d   :  { %v112_v16 = vpop.permute.xlu0 %111 }
  0x7e   :  { %vm116_vm1 = vcmp.eq.s32.totalorder %v112_v16, %v109_v14 }
  0x7f   :  { %v635_v21 = vsel %vm116_vm1, 1.0, %v723_v20 }
  0x85   :  { %v115_v23 = vpop.permute.xlu0 %114  ;;  %v127_v36 = vpop.permute.xlu1 %126 }
  0x86   :  { %vm117_vm5 = vcmp.eq.s32.totalorder %v115_v23, %v109_v14  ;;  %vm131_vm6 = vcmp.eq.s32.totalorder %v127_v36, %v109_v14 }
  0x87   :  { %v636_v24 = vsel %vm117_vm5, 1.0, %v723_v20  ;;  %v902_v38 = vsel %vm131_vm6, 1.0, %v723_v20 }
  0x88   :  { %vm340_vm12 = vcmp.gt.f32.partialorder %v902_v38, 0.5 }
  0x8c   :  { %v100_v17 = vpop.f32.mrf.mxu0 }
  0x8d   :  { %v101_v18 = vadd.f32 %v672_v15, %v100_v17  ;;  %v130_v40 = vpop.permute.xlu1 %129 }
  0x8e   :  { %vm132_vm7 = vcmp.eq.s32.totalorder %v130_v40, %v109_v14 }
  0x8f   :  { %vm103_vm2 = vcmp.gt.f32.partialorder %v101_v18, 0.0  ;;  %v104_v19 = vmul.f32 0.01, %v101_v18  ;;  %v910_v41 = vsel %vm132_vm7, 1.0, %v723_v20 }
  0x90   :  { %vm341_vm13 = vcmp.gt.f32.partialorder %v910_v41, 0.5 }
  0x91   :  { %v862_v22 = vsel %vm103_vm2, %v101_v18, %v104_v19 }
  0x92   :  { %165 = vmatpush.msra.mxu1 %v862_v22  ;;  %646 = vmatmul.msk.f32.vlgmr.msrb.gmra.mxu0 %vm209_vm3, %v862_v22 }
  0x93   :  { %640 = vmatmul.msk.f32.vlgmr.msra.gmra.mxu1 %vm143_vm4, %v635_v21 }
  0x94   :  { %v203_v42 = vpop.f32.mrf.mxu2 }
  0x9b   :  { %641 = vmatmul.msk.f32.gmra.mxu1 %vm143_vm4, %v636_v24  ;;  %v138_v24 = vshrl.u32 %v108_v13, 7  ;;  %v455_v13 = vld [vmem:[%s1007_s11 + $0x10] sm:$0xff] }
  0x9c   :  { %v206_v47 = vpop.f32.mrf.mxu2 }
  0x9d   :  { %vm140_vm14 = vcmp.eq.s32.totalorder %v673_v25, %v138_v24 }
  0x9e   :  { %v935_v27 = vsel %vm140_vm14, 1.0, %v723_v20  ;;  %v454_v20 = vld [vmem:[%s1007_s11 + $0x8] sm:$0xff] }
 0x10f   :  { %v269_v32 = vpop.f32.mrf.mxu0 }
 0x110   :  { %v167_v33 = vpop.f32.mrf.mxu1  ;;  %297 = vmatpush.msrb.mxu1 %v269_v32  ;;  %v529_v32 = vld [vmem:[#allocation2 + $0x18] sm:$0xff] }
 0x111   :  { %644 = vmatmul.msk.f32.vlgmr.msra.gmra.mxu3 %vm209_vm3, %v167_v33  ;;  %647 = vmatmul.msk.f32.vlgmr.msrb.gmra.mxu1 %vm143_vm4, %v902_v38  ;;  %v528_v33 = vld [vmem:[#allocation2 + $0x10] sm:$0xff] }
 0x118   :  { %v170_v34 = vpop.f32.mrf.mxu1 }
 0x119   :  { %645 = vmatmul.msk.f32.gmra.mxu3 %vm209_vm3, %v170_v34  ;;  %648 = vmatmul.msk.f32.gmra.mxu1 %vm143_vm4, %v910_v41  ;;  %v527_v34 = vld [vmem:[#allocation2 + $0x8] sm:$0xff] }
 0x18e   :  { %v299_v52 = vpop.f32.mrf.mxu1 }
 0x194   :  { %v233_v43 = vpop.f32.mrf.mxu3 }
 0x195   :  { %v234_v44 = vadd.f32 %v233_v43, %v203_v42 }
 0x196   :  { %v302_v57 = vpop.f32.mrf.mxu1 }
 0x197   :  { %vm239_vm8 = vcmp.gt.f32.partialorder %v234_v44, 0.0  ;;  %v241_v45 = vmul.f32 0.01, %v234_v44 }
 0x199   :  { %v914_v46 = vsel %vm239_vm8, %v234_v44, %v241_v45 }
 0x19a   :  { %649 = vmatmul.msk.f32.vlgmr.msrb.gmra.mxu2 %vm209_vm3, %v914_v46 }
 0x19c   :  { %v236_v48 = vpop.f32.mrf.mxu3 }
 0x19d   :  { %v237_v49 = vadd.f32 %v236_v48, %v206_v47 }
 0x19f   :  { %v242_v50 = vmul.f32 0.01, %v237_v49  ;;  %vm240_vm9 = vcmp.gt.f32.partialorder %v237_v49, 0.0 }
 0x1a1   :  { %v918_v51 = vsel %vm240_vm9, %v237_v49, %v242_v50 }
 0x1a2   :  { %650 = vmatmul.msk.f32.gmra.mxu2 %vm209_vm3, %v918_v51 }
 0x21d   :  { %v328_v53 = vpop.f32.mrf.mxu2 }
 0x21e   :  { %v329_v54 = vadd.f32 %v328_v53, %v299_v52 }
 0x220   :  { %vm334_vm10 = vcmp.gt.f32.partialorder %v329_v54, 0.0  ;;  %v336_v55 = vmul.f32 0.01, %v329_v54 }
 0x222   :  { %v338_v56 = vsel %vm334_vm10, %v329_v54, %v336_v55 }
 0x223   :  { %344 = vperm.xlu2 %671, %v338_v56  }
 0x225   :  { %v331_v58 = vpop.f32.mrf.mxu2 }
 0x226   :  { %v332_v59 = vadd.f32 %v331_v58, %v302_v57 }
 0x228   :  { %v337_v60 = vmul.f32 0.01, %v332_v59  ;;  %vm335_vm11 = vcmp.gt.f32.partialorder %v332_v59, 0.0 }
 0x22a   :  { %v339_v61 = vsel %vm335_vm11, %v332_v59, %v337_v60 }
 0x22b   :  { %349 = vperm.xlu2 %671, %v339_v61  }
 0x27d   :  { %v345_v62 = vpop.permute.xlu2 %344 }
 0x27e   :  { %v352_v63 = vsel %vm340_vm12, %v345_v62, -1e+30  ;;  %v674_v62 = vld [vmem:[%s1012_s16] ss:$0 sm:$0xff] }
 0x27f   :  { %v354_v2 = vsel %vm143_vm4, %v352_v63, -inf }
 0x285   :  { %v350_v0 = vpop.permute.xlu2 %349 }
 0x286   :  { %v353_v1 = vsel %vm341_vm13, %v350_v0, -1e+30 }
 0x287   :  { %v355_v3 = vsel %vm143_vm4, %v353_v1, -inf }
 0x288   :  { %v356_v4 = vmax.f32 %v354_v2, %v355_v3 }
 0x28a   :  { %v357_v5 = vrot.slane %v356_v4, 4 }
 0x28c   :  { %v358_v6 = vmax.f32 %v356_v4, %v357_v5 }
 0x28e   :  { %v359_v7 = vrot.slane %v358_v6, 2 }
 0x290   :  { %v360_v8 = vmax.f32 %v358_v6, %v359_v7  ;;  %v525_v7 = vld [vmem:[%s1009_s13 + $0x18] sm:$0xff] }
 0x291   :  { %550 = vmatpush.msra.mxu2 %v525_v7 }
 0x292   :  { %v361_v9 = vrot.slane %v360_v8, 1 }
 0x294   :  { %v362_v10 = vmax.f32 %v360_v8, %v361_v9  ;;  %v524_v8 = vld [vmem:[%s1009_s13 + $0x10] sm:$0xff]  ;;  %v523_v9 = vld [vmem:[%s1009_s13 + $0x8] sm:$0xff] }
 0x295   :  { %551 = vmatpush.msra.mxu2 %v524_v8 }
 0x296   :  { %v364_v11 = vmul.f32 %v910_v41, %v362_v10  ;;  %v363_v12 = vmul.f32 %v902_v38, %v362_v10  ;;  %v522_v10 = vld [vmem:[%s1009_s13] sm:$0xff]  ;;  %s726_s13 = smov 32  }
 0x297   :  { %552 = vmatpush.msra.mxu2 %v523_v9 }
 0x298   :  { %v368_v14 = vsel %vm143_vm4, %v364_v11, 0.0  ;;  %v365_v15 = vsel %vm143_vm4, %v363_v12, 0.0  ;;  %v675_v11 = vld [vmem:[%s1008_s12] ss:$0 sm:$0xff]  ;;  %s725_s12 = smov 96  }
 0x299   :  { %369 = vadd.xlane.f32.xlu0 %v368_v14  ;;  %366 = vadd.xlane.f32.xlu1 %v365_v15 }
 0x29a   :  { %553 = vmatpush.msra.mxu2 %v522_v10 }
 0x30c   :  { %v370_v16 = vpop.xlane.xlu0 %369  ;;  %v367_v17 = vpop.xlane.xlu1 %366 }
 0x30d   :  { %v372_v18 = vsub.f32 %v339_v61, %v370_v16  ;;  %v371_v19 = vsub.f32 %v338_v56, %v367_v17 }
 0x30f   :  { %v375_v21 = vmul.f32 1.442695, %v372_v18  ;;  %v373_v23 = vmul.f32 1.442695, %v371_v19 }
 0x311   :  { %677 = vpow2.f32 %v375_v21  ;;  %v676_v21 = vld [vmem:[%s1011_s15] ss:$0 sm:$0xff] }
 0x312   :  { %679 = vpow2.f32 %v373_v23 }
 0x317   :  { %v678_v26 = vpop.eup %677 }
 0x318   :  { %394 = vmatpush.msra.mxu0 %v678_v26  ;;  %v937_v28 = vpop.eup %679 }
 0x31a   :  { %395 = vmatpush.msra.mxu0 %v937_v28 }
 0x31b   :  { %651 = vmatmul.msk.f32.vlgmr.msra.gmra.mxu0 %vm79_vm0, %v935_v27 }
 0x31c   :  { %469 = vmatpush.msrb.mxu0 %v456_v29 }
 0x31e   :  { %470 = vmatpush.msrb.mxu0 %v455_v13 }
 0x320   :  { %471 = vmatpush.msrb.mxu0 %v454_v20 }
 0x322   :  { %472 = vmatpush.msrb.mxu0 %v453_v30 }
 0x323   :  { %654 = vmatmul.msk.f32.vlgmr.msrb.gmra.mxu0 %vm209_vm3, %v914_v46 }
 0x32b   :  { %655 = vmatmul.msk.f32.gmra.mxu0 %vm209_vm3, %v918_v51 }
 0x398   :  { %v397_v31 = vpop.f32.mrf.mxu0 }
 0x399   :  { %415 = vmatpush.msrb.mxu3 %v397_v31 }
 0x39a   :  { %652 = vmatmul.msk.f32.vlgmr.msrb.gmra.mxu3 %vm143_vm4, %v902_v38 }
 0x39b   :  { %573 = vmatpush.msra.mxu3 %v529_v32 }
 0x39d   :  { %574 = vmatpush.msra.mxu3 %v528_v33 }
 0x39f   :  { %575 = vmatpush.msra.mxu3 %v527_v34 }
 0x3a0   :  { %v474_v1 = vpop.f32.mrf.mxu0 }
 0x3a1   :  { %576 = vmatpush.msra.mxu3 %v526_v35 }
 0x3a2   :  { %653 = vmatmul.msk.f32.gmra.mxu3 %vm143_vm4, %v910_v41 }
 0x3a8   :  { %v477_v2 = vpop.f32.mrf.mxu0 }
 0x3aa   :  { %659 = vmatmul.msk.f32.vlgmr.msra.gmra.mxu3 %vm209_vm3, %v862_v22 }
 0x41d   :  { %v417_v36 = vpop.f32.mrf.mxu3 }
 0x41e   :  { %v418_v37 = vadd.f32 1e-16, %v417_v36 }
 0x420   :  { %681 = vrcp.f32 %v418_v37  ;;  %v434_v55 = vand.u32 2147483648, %v418_v37  ;;  %vm428_vm6 = vweird.f32 %v418_v37  ;;  %v432_v57 = vand.u32 2147483647, %v418_v37 }
 0x422   :  { %v435_v59 = vor.u32 1.1754944e-38, %v434_v55  ;;  %vm433_vm8 = vcmp.eq.f32.partialorder %v432_v57, 8.507059e+37 }
 0x425   :  { %v420_v39 = vpop.f32.mrf.mxu3 }
 0x426   :  { %v421_v40 = vadd.f32 1e-16, %v420_v39  ;;  %v682_v42 = vpop.eup %681 }
 0x427   :  { %v424_v38 = vmul.f32 %v682_v42, %v418_v37  ;;  %vm429_vm5 = vweird.f32 %v682_v42 }
 0x428   :  { %683 = vrcp.f32 %v421_v40  ;;  %v449_v47 = vand.u32 2147483648, %v421_v40  ;;  %v447_v49 = vand.u32 2147483647, %v421_v40  ;;  %vm443_vm1 = vweird.f32 %v421_v40  ;;  %vm430_vm7 = vmor %vm428_vm6, %vm429_vm5 }
 0x429   :  { %v425_v44 = vsub.f32 1.0, %v424_v38 }
 0x42a   :  { %v450_v51 = vor.u32 1.1754944e-38, %v449_v47  ;;  %vm448_vm4 = vcmp.eq.f32.partialorder %v447_v49, 8.507059e+37 }
 0x42b   :  { %v426_v41 = vmul.f32 %v682_v42, %v425_v44 }
 0x42d   :  { %v427_v53 = vadd.f32 %v682_v42, %v426_v41  ;;  %v578_v63 = vpop.f32.mrf.mxu3 }
 0x42e   :  { %v684_v43 = vpop.eup %683  ;;  %v579_v0 = vadd.f32 %v674_v62, %v578_v63 }
 0x42f   :  { %v439_v45 = vmul.f32 %v684_v43, %v421_v40  ;;  %vm444_vm15 = vweird.f32 %v684_v43  ;;  %v431_v58 = vsel %vm430_vm7, %v682_v42, %v427_v53 }
 0x430   :  { %vm445_vm2 = vmor %vm443_vm1, %vm444_vm15  ;;  %v436_v60 = vsel %vm433_vm8, %v435_v59, %v431_v58 }
 0x431   :  { %v440_v46 = vsub.f32 1.0, %v439_v45  ;;  %v437_v61 = vmul.f32 %v937_v28, %v436_v60 }
 0x433   :  { %v441_v48 = vmul.f32 %v684_v43, %v440_v46 }
 0x435   :  { %v442_v50 = vadd.f32 %v684_v43, %v441_v48 }
 0x437   :  { %v446_v52 = vsel %vm445_vm2, %v684_v43, %v442_v50 }
 0x438   :  { %v451_v54 = vsel %vm448_vm4, %v450_v51, %v446_v52 }
 0x439   :  { %v452_v56 = vmul.f32 %v678_v26, %v451_v54 }
 0x43b   :  { %487 = vperm.xlu2 %671, %v452_v56  }
 0x443   :  { %482 = vperm.xlu2 %671, %v437_v61  }
 0x44b   :  { %602 = vrot.lane.b32.xlu2 %v579_v0, %s724_s28 }
 0x495   :  { %v488_v3 = vpop.permute.xlu2 %487 }
 0x496   :  { %v491_v4 = vmul.f32 %v488_v3, %v477_v2 }
 0x498   :  { %510 = vmatpush.msra.mxu1 %v491_v4 }
 0x49d   :  { %v483_v5 = vpop.permute.xlu2 %482 }
 0x49e   :  { %v490_v6 = vmul.f32 %v483_v5, %v474_v1 }
 0x4a0   :  { %511 = vmatpush.msra.mxu1 %v490_v6 }
 0x4a1   :  { %656 = vmatmul.msk.f32.vlgmr.msra.gmra.mxu1 %vm79_vm0, %v935_v27 }
 0x4a5   :  { %v603_v36 = vpop.permute.xlu2 %602 }
 0x51e   :  { %v513_v12 = vpop.f32.mrf.mxu1 }
 0x51f   :  { %v514_v14 = vadd.f32 %v675_v11, %v513_v12 }
 0x521   :  { %v517_v15 = vmin.f32 %v514_v14, 0.0  ;;  %vm516_vm0 = vcmp.gt.f32.partialorder %v514_v14, 0.0 }
 0x523   :  { %v518_v16 = vmul.f32 1.442695, %v517_v15 }
 0x525   :  { %685 = vpow2.f32 %v518_v16 }
 0x52b   :  { %v686_v17 = vpop.eup %685 }
 0x52c   :  { %v657_v18 = vadd.f32 -1.0, %v686_v17 }
 0x52e   :  { %v521_v19 = vsel %vm516_vm0, %v514_v14, %v657_v18 }
 0x52f   :  { %658 = vmatmul.msk.f32.vlgmr.msra.gmra.mxu2 %vm209_vm3, %v521_v19 }
 0x5b2   :  { %v555_v23 = vpop.f32.mrf.mxu2 }
 0x5b3   :  { %v556_v24 = vadd.f32 %v676_v21, %v555_v23 }
 0x5b5   :  { %v581_v25 = vadd.f32 %v579_v0, %v556_v24 }
 0x5b7   :  { %v660_v26 = vmul.f32 -1.442695, %v581_v25 }
 0x5b9   :  { %687 = vpow2.f32 %v660_v26 }
 0x5bf   :  { %v688_v27 = vpop.eup %687 }
 0x5c0   :  { %v585_v28 = vadd.f32 1.0, %v688_v27 }
 0x5c2   :  { %689 = vrcp.f32 %v585_v28  ;;  %v597_v30 = vand.u32 2147483648, %v585_v28  ;;  %v595_v32 = vand.u32 2147483647, %v585_v28  ;;  %vm591_vm10 = vweird.f32 %v585_v28 }
 0x5c4   :  { %v598_v34 = vor.u32 1.1754944e-38, %v597_v30  ;;  %vm596_vm12 = vcmp.eq.f32.partialorder %v595_v32, 8.507059e+37 }
 0x5c8   :  { %v690_v29 = vpop.eup %689 }
 0x5c9   :  { %v587_v13 = vmul.f32 %v690_v29, %v585_v28  ;;  %vm592_vm9 = vweird.f32 %v690_v29 }
 0x5ca   :  { %vm593_vm11 = vmor %vm591_vm10, %vm592_vm9 }
 0x5cb   :  { %v588_v20 = vsub.f32 1.0, %v587_v13 }
 0x5cd   :  { %v589_v31 = vmul.f32 %v690_v29, %v588_v20 }
 0x5cf   :  { %v590_v33 = vadd.f32 %v690_v29, %v589_v31 }
 0x5d1   :  { %v594_v35 = vsel %vm593_vm11, %v690_v29, %v590_v33 }
 0x5d2   :  { %v599_v37 = vsel %vm596_vm12, %v598_v34, %v594_v35 }
 0x5d3   :  { %v605_v39 = vmul.f32 %v603_v36, %v599_v37  ;;  %v612_v44 = vsub.f32 1.0, %v599_v37 }
 0x5d5   :  { %607 = vrot.lane.b32.xlu2 %v605_v39, %s724_s28 }
 0x62f   :  { %v608_v40 = vpop.permute.xlu2 %607 }
 0x630   :  { %v610_v42 = vadd.f32 %v608_v40, %v556_v24 }
 0x632   :  { %691 = vtanh.f32 %v610_v42 }
 0x638   :  { %v692_v38 = vpop.eup %691 }
 0x639   :  { %614 = vrot.lane.b32.xlu2 %v692_v38, %s725_s12 }
 0x641   :  { %618 = vrot.lane.b32.xlu2 %v862_v22, %s726_s13 }
 0x693   :  { %v615_v43 = vpop.permute.xlu2 %614 }
 0x694   :  { %v617_v46 = vmul.f32 %v615_v43, %v612_v44 }
 0x69b   :  { %v619_v45 = vpop.permute.xlu2 %618 }
 0x69c   :  { %v621_v47 = vmul.f32 %v619_v45, %v599_v37 }
 0x69e   :  { %v622_v48 = vadd.f32 %v621_v47, %v617_v46 }
 0x6a0   :  { %v623_v49 = vmax.f32 %v622_v48, 0.0 }
 0x6a2   :  { %625 = vrot.lane.b32.xlu0 %v623_v49, %s725_s12 }
 0x714   :  { %v626_v41 = vpop.permute.xlu0 %625 }
 0x715   :  { %628 = vst.msk [vmem:[%s1013_s17] sm:$0xff] %vm209_vm3, %v626_v41 }
 0x716   :  { %633 = vsyncpa [#allocation3], 1 }

// kernel: attentive_fp_forward.5
= control target key start
LH: loop header
LB: loop body
LE: loop exit
PB: predicated region body
PF: predicated region fallthrough
CT: control target
= control target key end

     0   :  { %v48_v1 = vlaneseq  ;;  %vm85_vm0 = vcmask 64512   ;;  %s1183_s0 = inlined_call_operand.vmem [shape: f32[8,32], index: 0, kind: input, shape index: {}]   ;;  %s1184_s1 = inlined_call_operand.vmem [shape: s32[8,1], index: 1, kind: input, shape index: {}]   ;;  %s1185_s2 = inlined_call_operand.vmem [shape: s32[1,8], index: 2, kind: input, shape index: {}]   ;;  %s1186_s3 = inlined_call_operand.vmem [shape: f32[32,32], index: 3, kind: input, shape index: {}]   ;;  %s1187_s4 = inlined_call_operand.vmem [shape: f32[32,1], index: 4, kind: input, shape index: {}]   ;;  %s1188_s5 = inlined_call_operand.vmem [shape: f32[32,1], index: 5, kind: input, shape index: {}]   ;;  %s1189_s6 = inlined_call_operand.vmem [shape: f32[1,32], index: 6, kind: input, shape index: {}]   ;;  %s1190_s7 = inlined_call_operand.vmem [shape: f32[32,96], index: 7, kind: input, shape index: {}]   ;;  %s1191_s8 = inlined_call_operand.vmem [shape: f32[32,96], index: 8, kind: input, shape index: {}]   ;;  %s1192_s9 = inlined_call_operand.vmem [shape: f32[1,96], index: 9, kind: input, shape index: {}]   ;;  %s1193_s10 = inlined_call_operand.vmem [shape: f32[1,96], index: 10, kind: input, shape index: {}]   ;;  %s1194_s11 = inlined_call_operand.vmem [shape: f32[32,4], index: 11, kind: input, shape index: {}]   ;;  %s1195_s12 = inlined_call_operand.vmem [shape: f32[1,4], index: 12, kind: input, shape index: {}]   ;;  %s1196_s13 = inlined_call_operand.hbm [shape: f32[2,4], index: 13, kind: output, shape index: {}]  }
   0x1   :  { %v45_v0 = vld [vmem:[%s1183_s0] sm:$0xff]  ;;  %v939_v3 = vld [vmem:[%s1186_s3 + $0x18] sm:$0xff]  ;;  %v944_v4 = vld [vmem:[%s1186_s3 + $0x10] sm:$0xff] }
   0x2   :  { %v799_v2 = vld [vmem:[%s1185_s2] ss:$0 sm:$0xff]  ;;  %104 = vmatpush.msra.mxu0 %v45_v0  ;;  %v57_v5 = vshrl.u32 %v48_v1, 7  ;;  %172 = vmatpush.msra.mxu3 %v939_v3 }
   0x3   :  { %126 = vmatpush.msra.mxu1 %v939_v3 }
   0x4   :  { %18 = vsyncpa [#allocation3], 0  ;;  %vm59_vm1 = vcmp.eq.s32.totalorder %v799_v2, %v57_v5  ;;  %173 = vmatpush.msra.mxu3 %v944_v4  ;;  %v854_v6 = vmov 0.0   ;;  %v957_v8 = vld [vmem:[%s1186_s3 + $0x8] sm:$0xff]  ;;  %v964_v9 = vld [vmem:[%s1186_s3] sm:$0xff]  ;;  %vm110_vm2 = vcmask 261120  }
   0x5   :  { %127 = vmatpush.msra.mxu1 %v944_v4  ;;  %v950_v7 = vsel %vm59_vm1, 1.0, %v854_v6  ;;  %v971_v10 = vld [vmem:[%s1188_s5 + $0x18] sm:$0xff]  ;;  %v977_v11 = vld [vmem:[%s1188_s5 + $0x10] sm:$0xff]  ;;  %v983_v12 = vld [vmem:[%s1188_s5 + $0x8] sm:$0xff]  ;;  %v855_v19 = vmov 0   ;;  %v49_v24 = vand.u32 127, %v48_v1 }
   0x6   :  { %762 = vmatmul.msk.f32.vlgmr.msra.gmra.mxu0 %vm85_vm0, %v950_v7  ;;  %174 = vmatpush.msra.mxu3 %v957_v8  ;;  %v994_v15 = vld [vmem:[%s1188_s5] sm:$0xff]  ;;  %v69_v17 = vld [vmem:[%s1187_s4 + $0x18] sm:$0xff]  ;;  %v68_v18 = vld [vmem:[%s1187_s4 + $0x10] sm:$0xff]  ;;  %vm207_vm4 = vcmask 1041408   ;;  %vm203_vm5 = vcmask 15360  }
   0x7   :  { %128 = vmatpush.msra.mxu1 %v957_v8  ;;  %195 = vmatpush.msrb.mxu0 %v971_v10  ;;  %v46_v16 = vld [vmem:[%s1184_s1] sm:$0xff]  ;;  %v67_v20 = vld [vmem:[%s1187_s4 + $0x8] sm:$0xff]  ;;  %v1034_v48 = vld [vmem:[%s1191_s8 + $0x18] sm:$0xff] }
   0x8   :  { %175 = vmatpush.msra.mxu3 %v964_v9  ;;  %796 = vset.pattern.permute.xlu0 %v855_v19  ;;  %v66_v21 = vld [vmem:[%s1187_s4] sm:$0xff]  ;;  %v1041_v49 = vld [vmem:[%s1191_s8 + $0x10] sm:$0xff]  ;;  %v1047_v50 = vld [vmem:[%s1191_s8 + $0x8] sm:$0xff] }
   0x9   :  { %129 = vmatpush.msra.mxu1 %v964_v9  ;;  %196 = vmatpush.msrb.mxu0 %v977_v11  ;;  %v1053_v51 = vld [vmem:[%s1191_s8] sm:$0xff]  ;;  %s856_s8 = smov 64  }
   0xa   :  { %763 = vmatmul.msk.f32.vlgmr.msra.gmra.mxu1 %vm110_vm2, %v45_v0  ;;  %149 = vmatpush.msra.mxu2 %v69_v17  ;;  %v1066_v53 = vld [vmem:[%s1193_s10] ss:$0 sm:$0xff] }
   0xb   :  { %197 = vmatpush.msrb.mxu0 %v983_v12  ;;  %51 = vperm.xlu0 %796, %v46_v16  }
   0xc   :  { %797 = vset.pattern.permute.xlu1 %v855_v19  ;;  %150 = vmatpush.msra.mxu2 %v68_v18 }
   0xd   :  { %198 = vmatpush.msrb.mxu0 %v994_v15  ;;  %798 = vset.pattern.permute.xlu2 %v855_v19 }
   0xe   :  { %151 = vmatpush.msra.mxu2 %v67_v20 }
  0x10   :  { %152 = vmatpush.msra.mxu2 %v66_v21  ;;  %v1114_v21 = vld [vmem:[%s1192_s9] ss:$0 sm:$0xff]  ;;  %s858_s9 = smov 96  }
  0x7d   :  { %v52_v25 = vpop.permute.xlu0 %51 }
  0x7e   :  { %vm53_vm3 = vcmp.eq.s32.totalorder %v52_v25, %v49_v24 }
  0x7f   :  { %v1017_v26 = vsel %vm53_vm3, 1.0, %v854_v6 }
  0x80   :  { %vm235_vm7 = vcmp.gt.f32.partialorder %v1017_v26, 0.5 }
  0x83   :  { %v106_v13 = vpop.f32.mrf.mxu0 }
  0x84   :  { %v987_v14 = vmax.f32 %v106_v13, 0.0 }
  0x86   :  { %765 = vmatmul.msk.f32.vlgmr.msra.gmra.mxu3 %vm110_vm2, %v987_v14 }
  0x87   :  { %v1012_v22 = vpop.f32.mrf.mxu1 }
  0x88   :  { %764 = vmatmul.msk.f32.vlgmr.msra.gmra.mxu2 %vm110_vm2, %v1012_v22 }
 0x109   :  { %v177_v23 = vpop.f32.mrf.mxu3 }
 0x10a   :  { %766 = vmatmul.msk.f32.vlgmr.msrb.gmra.mxu0 %vm110_vm2, %v177_v23 }
 0x10b   :  { %v1022_v28 = vpop.f32.mrf.mxu2 }
 0x187   :  { %v200_v27 = vpop.f32.mrf.mxu0 }
 0x188   :  { %767 = vmatpush.msk.msrb.mxu1 %vm207_vm4, %v200_v27 }
 0x189   :  { %768 = vmatmul.msk.f32.vlgmr.msrb.gmra.mxu1 %vm203_vm5, %v1017_v26 }
 0x206   :  { %v228_v29 = vpop.f32.mrf.mxu1 }
 0x207   :  { %v231_v30 = vadd.f32 %v228_v29, %v1022_v28 }
 0x209   :  { %v233_v31 = vmul.f32 0.01, %v231_v30  ;;  %vm232_vm6 = vcmp.gt.f32.partialorder %v231_v30, 0.0 }
 0x20b   :  { %v234_v32 = vsel %vm232_vm6, %v231_v30, %v233_v31 }
 0x20c   :  { %238 = vperm.xlu0 %796, %v234_v32  }
 0x27e   :  { %v239_v33 = vpop.permute.xlu0 %238 }
 0x27f   :  { %v241_v34 = vsel %vm235_vm7, %v239_v33, -1e+30 }
 0x280   :  { %v242_v35 = vsel %vm203_vm5, %v241_v34, -inf }
 0x281   :  { %v243_v36 = vrot.slane %v242_v35, 4 }
 0x283   :  { %v244_v37 = vmax.f32 %v242_v35, %v243_v36 }
 0x285   :  { %v245_v38 = vrot.slane %v244_v37, 2 }
 0x287   :  { %v246_v39 = vmax.f32 %v244_v37, %v245_v38 }
 0x289   :  { %v247_v40 = vrot.slane %v246_v39, 1 }
 0x28b   :  { %v248_v41 = vmax.f32 %v246_v39, %v247_v40 }
 0x28d   :  { %v249_v42 = vmul.f32 %v1017_v26, %v248_v41 }
 0x28f   :  { %v250_v43 = vsel %vm203_vm5, %v249_v42, 0.0 }
 0x290   :  { %251 = vadd.xlane.f32.xlu1 %v250_v43 }
 0x303   :  { %v252_v44 = vpop.xlane.xlu1 %251 }
 0x304   :  { %v253_v45 = vsub.f32 %v234_v32, %v252_v44 }
 0x306   :  { %v254_v46 = vmul.f32 1.442695, %v253_v45 }
 0x308   :  { %804 = vpow2.f32 %v254_v46 }
 0x30e   :  { %v805_v47 = vpop.eup %804 }
 0x30f   :  { %271 = vmatpush.msrb.mxu2 %v805_v47 }
 0x310   :  { %769 = vmatmul.msk.f32.vlgmr.msrb.gmra.mxu2 %vm85_vm0, %v950_v7 }
 0x311   :  { %390 = vmatpush.msra.mxu2 %v1034_v48 }
 0x313   :  { %391 = vmatpush.msra.mxu2 %v1041_v49 }
 0x315   :  { %392 = vmatpush.msra.mxu2 %v1047_v50 }
 0x317   :  { %393 = vmatpush.msra.mxu2 %v1053_v51 }
 0x318   :  { %775 = vmatmul.msk.f32.vlgmr.msra.gmra.mxu2 %vm110_vm2, %v987_v14 }
 0x393   :  { %v273_v52 = vpop.f32.mrf.mxu2 }
 0x394   :  { %770 = vmatpush.msk.msrb.mxu3 %vm207_vm4, %v273_v52 }
 0x395   :  { %771 = vmatmul.msk.f32.vlgmr.msrb.gmra.mxu3 %vm203_vm5, %v1017_v26 }
 0x396   :  { %458 = vmatpush.msra.mxu3 %v939_v3 }
 0x398   :  { %459 = vmatpush.msra.mxu3 %v944_v4 }
 0x39a   :  { %460 = vmatpush.msra.mxu3 %v957_v8  ;;  %v1083_v8 = vld [vmem:[%s1190_s7 + $0x18] sm:$0xff] }
 0x39b   :  { %v395_v54 = vpop.f32.mrf.mxu2  ;;  %367 = vmatpush.msra.mxu1 %v1083_v8 }
 0x39c   :  { %v396_v55 = vadd.f32 %v1066_v53, %v395_v54  ;;  %461 = vmatpush.msra.mxu3 %v964_v9  ;;  %v1089_v9 = vld [vmem:[%s1190_s7 + $0x10] sm:$0xff] }
 0x39d   :  { %368 = vmatpush.msra.mxu1 %v1089_v9 }
 0x39e   :  { %419 = vrot.lane.b32.xlu2 %v396_v55, %s856_s8 }
 0x3f8   :  { %v420_v40 = vpop.permute.xlu2 %419 }
 0x418   :  { %v296_v56 = vpop.f32.mrf.mxu3 }
 0x419   :  { %v297_v57 = vadd.f32 1e-16, %v296_v56 }
 0x41b   :  { %806 = vrcp.f32 %v297_v57  ;;  %v310_v61 = vand.u32 2147483648, %v297_v57  ;;  %v308_v63 = vand.u32 2147483647, %v297_v57  ;;  %vm304_vm9 = vweird.f32 %v297_v57 }
 0x41d   :  { %v311_v1 = vor.u32 1.1754944e-38, %v310_v61  ;;  %vm309_vm11 = vcmp.eq.f32.partialorder %v308_v63, 8.507059e+37 }
 0x421   :  { %v807_v58 = vpop.eup %806 }
 0x422   :  { %v300_v59 = vmul.f32 %v807_v58, %v297_v57  ;;  %vm305_vm8 = vweird.f32 %v807_v58 }
 0x423   :  { %vm306_vm10 = vmor %vm304_vm9, %vm305_vm8 }
 0x424   :  { %v301_v60 = vsub.f32 1.0, %v300_v59 }
 0x426   :  { %v302_v62 = vmul.f32 %v807_v58, %v301_v60 }
 0x428   :  { %v303_v0 = vadd.f32 %v807_v58, %v302_v62 }
 0x42a   :  { %v307_v2 = vsel %vm306_vm10, %v807_v58, %v303_v0 }
 0x42b   :  { %v312_v3 = vsel %vm309_vm11, %v311_v1, %v307_v2 }
 0x42c   :  { %v313_v4 = vmul.f32 %v805_v47, %v312_v3 }
 0x42e   :  { %316 = vperm.xlu1 %797, %v313_v4  }
 0x4a0   :  { %v317_v5 = vpop.permute.xlu1 %316 }
 0x4a1   :  { %v319_v6 = vmul.f32 %v317_v5, %v1012_v22 }
 0x4a3   :  { %338 = vmatpush.msra.mxu0 %v319_v6 }
 0x4a4   :  { %772 = vmatmul.msk.f32.vlgmr.msra.gmra.mxu0 %vm85_vm0, %v950_v7 }
 0x4a5   :  { %481 = vmatpush.msrb.mxu0 %v971_v10  ;;  %v1095_v10 = vld [vmem:[%s1190_s7 + $0x8] sm:$0xff] }
 0x4a6   :  { %369 = vmatpush.msra.mxu1 %v1095_v10 }
 0x4a7   :  { %482 = vmatpush.msrb.mxu0 %v977_v11  ;;  %v1101_v11 = vld [vmem:[%s1190_s7] sm:$0xff] }
 0x4a8   :  { %370 = vmatpush.msra.mxu1 %v1101_v11 }
 0x4a9   :  { %483 = vmatpush.msrb.mxu0 %v983_v12  ;;  %v1107_v12 = vld [vmem:[%s1189_s6] ss:$0 sm:$0xff]  ;;  %s857_s6 = smov 32  }
 0x4ab   :  { %484 = vmatpush.msrb.mxu0 %v994_v15 }
 0x521   :  { %v340_v13 = vpop.f32.mrf.mxu0 }
 0x522   :  { %v341_v15 = vadd.f32 %v1107_v12, %v340_v13 }
 0x524   :  { %v344_v16 = vmin.f32 %v341_v15, 0.0  ;;  %vm343_vm12 = vcmp.gt.f32.partialorder %v341_v15, 0.0 }
 0x526   :  { %v345_v17 = vmul.f32 1.442695, %v344_v16 }
 0x528   :  { %808 = vpow2.f32 %v345_v17 }
 0x52e   :  { %v809_v18 = vpop.eup %808 }
 0x52f   :  { %v773_v19 = vadd.f32 -1.0, %v809_v18 }
 0x531   :  { %v348_v20 = vsel %vm343_vm12, %v341_v15, %v773_v19  ;;  %vm742_vm12 = vcmask 25600  }
 0x532   :  { %774 = vmatmul.msk.f32.vlgmr.msra.gmra.mxu1 %vm110_vm2, %v348_v20 }
 0x5af   :  { %v372_v23 = vpop.f32.mrf.mxu1 }
 0x5b0   :  { %v373_v24 = vadd.f32 %v1114_v21, %v372_v23 }
 0x5b2   :  { %v398_v25 = vadd.f32 %v396_v55, %v373_v24 }
 0x5b4   :  { %v776_v27 = vmul.f32 -1.442695, %v398_v25 }
 0x5b6   :  { %810 = vpow2.f32 %v776_v27 }
 0x5bc   :  { %v811_v29 = vpop.eup %810 }
 0x5bd   :  { %v402_v30 = vadd.f32 1.0, %v811_v29 }
 0x5bf   :  { %812 = vrcp.f32 %v402_v30  ;;  %v414_v34 = vand.u32 2147483648, %v402_v30  ;;  %v412_v36 = vand.u32 2147483647, %v402_v30  ;;  %vm408_vm14 = vweird.f32 %v402_v30 }
 0x5c1   :  { %v415_v38 = vor.u32 1.1754944e-38, %v414_v34  ;;  %vm413_vm1 = vcmp.eq.f32.partialorder %v412_v36, 8.507059e+37 }
 0x5c5   :  { %v813_v31 = vpop.eup %812 }
 0x5c6   :  { %v404_v32 = vmul.f32 %v813_v31, %v402_v30  ;;  %vm409_vm13 = vweird.f32 %v813_v31 }
 0x5c7   :  { %vm410_vm15 = vmor %vm408_vm14, %vm409_vm13 }
 0x5c8   :  { %v405_v33 = vsub.f32 1.0, %v404_v32 }
 0x5ca   :  { %v406_v35 = vmul.f32 %v813_v31, %v405_v33 }
 0x5cc   :  { %v407_v37 = vadd.f32 %v813_v31, %v406_v35 }
 0x5ce   :  { %v411_v39 = vsel %vm410_vm15, %v813_v31, %v407_v37 }
 0x5cf   :  { %v416_v41 = vsel %vm413_vm1, %v415_v38, %v411_v39 }
 0x5d0   :  { %v422_v42 = vmul.f32 %v420_v40, %v416_v41  ;;  %v429_v47 = vsub.f32 1.0, %v416_v41 }
 0x5d2   :  { %424 = vrot.lane.b32.xlu2 %v422_v42, %s856_s8 }
 0x5da   :  { %435 = vrot.lane.b32.xlu2 %v987_v14, %s857_s6 }
 0x62c   :  { %v425_v43 = vpop.permute.xlu2 %424 }
 0x62d   :  { %v427_v44 = vadd.f32 %v425_v43, %v373_v24 }
 0x62f   :  { %814 = vtanh.f32 %v427_v44 }
 0x634   :  { %v436_v46 = vpop.permute.xlu2 %435 }
 0x635   :  { %v815_v45 = vpop.eup %814  ;;  %v438_v54 = vmul.f32 %v436_v46, %v416_v41 }
 0x636   :  { %431 = vrot.lane.b32.xlu0 %v815_v45, %s858_s9 }
 0x6a8   :  { %v432_v52 = vpop.permute.xlu0 %431 }
 0x6a9   :  { %v434_v55 = vmul.f32 %v432_v52, %v429_v47 }
 0x6ab   :  { %v1120_v56 = vadd.f32 %v438_v54, %v434_v55 }
 0x6ad   :  { %v440_v57 = vmax.f32 %v1120_v56, 0.0 }
 0x6af   :  { %442 = vrot.lane.b32.xlu0 %v440_v57, %s858_s9 }
 0x721   :  { %v443_v14 = vpop.permute.xlu0 %442 }
 0x722   :  { %777 = vmatmul.msk.f32.vlgmr.msra.gmra.mxu3 %vm110_vm2, %v443_v14 }
 0x7a5   :  { %v463_v58 = vpop.f32.mrf.mxu3 }
 0x7a6   :  { %778 = vmatmul.msk.f32.vlgmr.msrb.gmra.mxu0 %vm110_vm2, %v463_v58 }
 0x823   :  { %v486_v59 = vpop.f32.mrf.mxu0 }
 0x824   :  { %779 = vmatpush.msk.msrb.mxu1 %vm207_vm4, %v486_v59 }
 0x825   :  { %780 = vmatmul.msk.f32.vlgmr.msrb.gmra.mxu1 %vm203_vm5, %v1017_v26 }
 0x826   :  { %641 = vmatpush.msra.mxu1 %v1083_v8 }
 0x828   :  { %642 = vmatpush.msra.mxu1 %v1089_v9 }
 0x82a   :  { %643 = vmatpush.msra.mxu1 %v1095_v10 }
 0x82c   :  { %644 = vmatpush.msra.mxu1 %v1101_v11 }
 0x8a2   :  { %v509_v60 = vpop.f32.mrf.mxu1 }
 0x8a3   :  { %v512_v61 = vadd.f32 %v509_v60, %v1022_v28 }
 0x8a5   :  { %v514_v62 = vmul.f32 0.01, %v512_v61  ;;  %vm513_vm3 = vcmp.gt.f32.partialorder %v512_v61, 0.0 }
 0x8a7   :  { %v515_v63 = vsel %vm513_vm3, %v512_v61, %v514_v62 }
 0x8a8   :  { %518 = vperm.xlu2 %798, %v515_v63  }
 0x902   :  { %v519_v0 = vpop.permute.xlu2 %518 }
 0x903   :  { %v521_v1 = vsel %vm235_vm7, %v519_v0, -1e+30  ;;  %v711_v0 = vld [vmem:[%s1194_s11 + $0x10] sm:$0xff] }
 0x904   :  { %v522_v2 = vsel %vm203_vm5, %v521_v1, -inf  ;;  %v710_v1 = vld [vmem:[%s1194_s11 + $0x8] sm:$0xff] }
 0x905   :  { %v523_v3 = vrot.slane %v522_v2, 4 }
 0x907   :  { %v524_v4 = vmax.f32 %v522_v2, %v523_v3  ;;  %v709_v2 = vld [vmem:[%s1194_s11] sm:$0xff] }
 0x909   :  { %v525_v5 = vrot.slane %v524_v4, 2 }
 0x90b   :  { %v526_v6 = vmax.f32 %v524_v4, %v525_v5 }
 0x90d   :  { %v527_v8 = vrot.slane %v526_v6, 1 }
 0x90f   :  { %v528_v9 = vmax.f32 %v526_v6, %v527_v8 }
 0x911   :  { %v529_v10 = vmul.f32 %v1017_v26, %v528_v9 }
 0x913   :  { %v530_v28 = vsel %vm203_vm5, %v529_v10, 0.0 }
 0x914   :  { %531 = vadd.xlane.f32.xlu0 %v530_v28  ;;  %v803_v28 = vld [vmem:[%s1195_s12] ss:$0 sm:$0xff] }
 0x987   :  { %v532_v11 = vpop.xlane.xlu0 %531 }
 0x988   :  { %v533_v13 = vsub.f32 %v515_v63, %v532_v11  ;;  %v712_v63 = vld [vmem:[%s1194_s11 + $0x18] sm:$0xff]  ;;  %s859_s11 = smov [#allocation2]  }
 0x989   :  { %s749_s20 = sshll.u32 %s859_s11, 4  ;;  %s750_s20 = int_to_ptr.vmem [resolvable:$true] %s749_s20 }
 0x98a   :  { %v534_v15 = vmul.f32 1.442695, %v533_v13 }
 0x98c   :  { %816 = vpow2.f32 %v534_v15 }
 0x992   :  { %v817_v16 = vpop.eup %816 }
 0x993   :  { %551 = vmatpush.msrb.mxu2 %v817_v16 }
 0x994   :  { %781 = vmatmul.msk.f32.vlgmr.msrb.gmra.mxu2 %vm85_vm0, %v950_v7 }
 0x995   :  { %661 = vmatpush.msra.mxu2 %v1034_v48 }
 0x997   :  { %662 = vmatpush.msra.mxu2 %v1041_v49 }
 0x999   :  { %663 = vmatpush.msra.mxu2 %v1047_v50 }
 0x99b   :  { %664 = vmatpush.msra.mxu2 %v1053_v51 }
 0x99c   :  { %787 = vmatmul.msk.f32.vlgmr.msra.gmra.mxu2 %vm110_vm2, %v443_v14 }
 0xa17   :  { %v553_v17 = vpop.f32.mrf.mxu2 }
 0xa18   :  { %782 = vmatpush.msk.msrb.mxu3 %vm207_vm4, %v553_v17 }
 0xa19   :  { %783 = vmatmul.msk.f32.vlgmr.msrb.gmra.mxu3 %vm203_vm5, %v1017_v26 }
 0xa1a   :  { %734 = vmatpush.msra.mxu3 %v712_v63 }
 0xa1c   :  { %735 = vmatpush.msra.mxu3 %v711_v0 }
 0xa1e   :  { %736 = vmatpush.msra.mxu3 %v710_v1 }
 0xa1f   :  { %v666_v18 = vpop.f32.mrf.mxu2 }
 0xa20   :  { %v667_v19 = vadd.f32 %v1066_v53, %v666_v18  ;;  %737 = vmatpush.msra.mxu3 %v709_v2 }
 0xa22   :  { %690 = vrot.lane.b32.xlu1 %v667_v19, %s856_s8 }
 0xa9c   :  { %v576_v48 = vpop.f32.mrf.mxu3 }
 0xa9d   :  { %v577_v20 = vadd.f32 1e-16, %v576_v48 }
 0xa9f   :  { %818 = vrcp.f32 %v577_v20  ;;  %v590_v51 = vand.u32 2147483648, %v577_v20  ;;  %v588_v25 = vand.u32 2147483647, %v577_v20  ;;  %vm584_vm4 = vweird.f32 %v577_v20 }
 0xaa1   :  { %v591_v29 = vor.u32 1.1754944e-38, %v590_v51  ;;  %vm589_vm5 = vcmp.eq.f32.partialorder %v588_v25, 8.507059e+37 }
 0xaa5   :  { %v819_v49 = vpop.eup %818 }
 0xaa6   :  { %v580_v50 = vmul.f32 %v819_v49, %v577_v20  ;;  %vm585_vm6 = vweird.f32 %v819_v49 }
 0xaa7   :  { %vm586_vm7 = vmor %vm584_vm4, %vm585_vm6 }
 0xaa8   :  { %v581_v23 = vsub.f32 1.0, %v580_v50 }
 0xaaa   :  { %v582_v24 = vmul.f32 %v819_v49, %v581_v23 }
 0xaac   :  { %v583_v27 = vadd.f32 %v819_v49, %v582_v24 }
 0xaae   :  { %v587_v26 = vsel %vm586_vm7, %v819_v49, %v583_v27 }
 0xaaf   :  { %v592_v30 = vsel %vm589_vm5, %v591_v29, %v587_v26 }
 0xab0   :  { %v593_v53 = vmul.f32 %v817_v16, %v592_v30 }
 0xab2   :  { %596 = vperm.xlu2 %798, %v593_v53  }
 0xb0c   :  { %v597_v31 = vpop.permute.xlu2 %596 }
 0xb0d   :  { %v599_v32 = vmul.f32 %v597_v31, %v1012_v22 }
 0xb0f   :  { %615 = vmatpush.msra.mxu0 %v599_v32 }
 0xb10   :  { %784 = vmatmul.msk.f32.vlgmr.msra.gmra.mxu0 %vm85_vm0, %v950_v7 }
 0xb8d   :  { %v617_v33 = vpop.f32.mrf.mxu0 }
 0xb8e   :  { %v618_v34 = vadd.f32 %v1107_v12, %v617_v33 }
 0xb90   :  { %v621_v35 = vmin.f32 %v618_v34, 0.0  ;;  %vm620_vm8 = vcmp.gt.f32.partialorder %v618_v34, 0.0 }
 0xb92   :  { %v622_v36 = vmul.f32 1.442695, %v621_v35 }
 0xb94   :  { %820 = vpow2.f32 %v622_v36 }
 0xb9a   :  { %v821_v37 = vpop.eup %820 }
 0xb9b   :  { %v785_v38 = vadd.f32 -1.0, %v821_v37 }
 0xb9d   :  { %v625_v39 = vsel %vm620_vm8, %v618_v34, %v785_v38 }
 0xb9e   :  { %786 = vmatmul.msk.f32.vlgmr.msra.gmra.mxu1 %vm110_vm2, %v625_v39 }
 0xc1b   :  { %v646_v40 = vpop.f32.mrf.mxu1 }
 0xc1c   :  { %v647_v41 = vadd.f32 %v1114_v21, %v646_v40  ;;  %v691_v21 = vpop.permute.xlu1 %690 }
 0xc1e   :  { %v669_v22 = vadd.f32 %v667_v19, %v647_v41 }
 0xc20   :  { %v788_v42 = vmul.f32 -1.442695, %v669_v22 }
 0xc22   :  { %822 = vpow2.f32 %v788_v42 }
 0xc28   :  { %v823_v43 = vpop.eup %822 }
 0xc29   :  { %v673_v7 = vadd.f32 1.0, %v823_v43 }
 0xc2b   :  { %824 = vrcp.f32 %v673_v7  ;;  %v685_v46 = vand.u32 2147483648, %v673_v7  ;;  %v683_v52 = vand.u32 2147483647, %v673_v7  ;;  %vm679_vm9 = vweird.f32 %v673_v7 }
 0xc2d   :  { %v686_v55 = vor.u32 1.1754944e-38, %v685_v46  ;;  %vm684_vm11 = vcmp.eq.f32.partialorder %v683_v52, 8.507059e+37 }
 0xc31   :  { %v825_v44 = vpop.eup %824 }
 0xc32   :  { %v675_v12 = vmul.f32 %v825_v44, %v673_v7  ;;  %vm680_vm0 = vweird.f32 %v825_v44 }
 0xc33   :  { %vm681_vm10 = vmor %vm679_vm9, %vm680_vm0 }
 0xc34   :  { %v676_v45 = vsub.f32 1.0, %v675_v12 }
 0xc36   :  { %v677_v47 = vmul.f32 %v825_v44, %v676_v45 }
 0xc38   :  { %v678_v54 = vadd.f32 %v825_v44, %v677_v47 }
 0xc3a   :  { %v682_v14 = vsel %vm681_vm10, %v825_v44, %v678_v54 }
 0xc3b   :  { %v687_v58 = vsel %vm684_vm11, %v686_v55, %v682_v14 }
 0xc3c   :  { %v693_v59 = vmul.f32 %v691_v21, %v687_v58  ;;  %v700_v3 = vsub.f32 1.0, %v687_v58  ;;  %v706_v5 = vmul.f32 %v687_v58, %v440_v57 }
 0xc3e   :  { %695 = vrot.lane.b32.xlu2 %v693_v59, %s856_s8  ;;  %s751_s8 = sshll.u32 %s1196_s13, 4  ;;  %s752_s8 = int_to_ptr.hbm [resolvable:$true] %s751_s8 }
 0xc98   :  { %v696_v60 = vpop.permute.xlu2 %695 }
 0xc99   :  { %v698_v61 = vadd.f32 %v696_v60, %v647_v41 }
 0xc9b   :  { %826 = vtanh.f32 %v698_v61 }
 0xca1   :  { %v827_v62 = vpop.eup %826 }
 0xca2   :  { %702 = vrot.lane.b32.xlu1 %v827_v62, %s858_s9 }
 0xd14   :  { %v703_v4 = vpop.permute.xlu1 %702 }
 0xd15   :  { %v705_v6 = vmul.f32 %v703_v4, %v700_v3 }
 0xd17   :  { %v707_v8 = vadd.f32 %v706_v5, %v705_v6 }
 0xd19   :  { %v708_v9 = vmax.f32 %v707_v8, 0.0 }
 0xd1b   :  { %718 = vrot.lane.b32.xlu2 %v708_v9, %s858_s9 }
 0xd75   :  { %v719_v10 = vpop.permute.xlu2 %718 }
 0xd76   :  { %789 = vmatmul.msk.f32.vlgmr.msra.gmra.mxu3 %vm110_vm2, %v719_v10 }
 0xdf9   :  { %v739_v56 = vpop.f32.mrf.mxu3 }
 0xdfa   :  { %v740_v57 = vadd.f32 %v803_v28, %v739_v56 }
 0xdfc   :  { %743 = vst.msk [vmem:[#allocation2] sm:$0x3] %vm742_vm12, %v740_v57 }
 0xdfd   :  { %754 = dma.vmem_to_hbm [thread:$0]  %s750_s20, 32, %s752_s8, [#allocation3]  }
 0xdfe   :  { %852 = dma.done.wait [#allocation3], 32  }
 0xdff   :  { %853 = vsyncadd [#allocation3], 4294967264 }
 0xe00   :  { %759 = vsyncpa [#allocation3], 1 }

</bundles_post_ra>
